<compile_context>
chip_gen: v5e
topology: v5e:2x2
jax: 0.10.0
libtpu: 0.0.40
codegen_flags: <defaults>
</compile_context>

<pallas_src>
import functools
import math

import jax
import jax.numpy as jnp
from jax.experimental import pallas as pl
from jax.experimental.pallas import tpu as pltpu


def _vmem_limit_bytes():
    """Generation-aware scoped-VMEM limit: ~75% of physical VMEM."""
    try:
        cap = int(pltpu.get_tpu_info().vmem_capacity_bytes)
    except Exception:  # no TPU info available -> conservative default
        cap = 64 * 1024 * 1024
    return max(32 * 1024 * 1024, (cap * 3) // 4)


def _dff_attention_kernel(x_ref, w_ref, b_ref, o_ref, *,
                          num_heads, head_dim, q_block, compute_dtype,
                          approx_recip):
    """One (batch, query-tile) element per grid step.

    x_ref : (1, S, H)   hidden_states tile, already in compute_dtype
    w_ref : (H, 3H)     fused, pre-transposed, pre-scaled QKV weight
    b_ref : (1, 3H)     fused bias (f32, q-part pre-scaled)
    o_ref : (1, tq, H)  context_layer output tile
    """
    S = x_ref.shape[1]
    H = num_heads * head_dim

    # ---- K/V projection over the full sequence (f32 accumulation) ----------
    x_all = x_ref[0]                                                    # (S, H)
    kv = jnp.dot(x_all, w_ref[:, H:], preferred_element_type=jnp.float32)
    kv = kv + b_ref[:, H:]                                              # (S, 2H) f32
    k = kv[:, :H].reshape(S, num_heads, head_dim).astype(compute_dtype)
    v = kv[:, H:].reshape(S, num_heads, head_dim).astype(compute_dtype)

    # ---- Q projection for this query tile only (scale folded into Wq/bq) ---
    row0 = pl.multiple_of(pl.program_id(1) * q_block, q_block)
    xq = x_ref[0, pl.ds(row0, q_block), :]                              # (tq, H)
    q = jnp.dot(xq, w_ref[:, :H], preferred_element_type=jnp.float32)
    q = (q + b_ref[:, :H]).reshape(q_block, num_heads, head_dim)
    q = q.astype(compute_dtype)

    # scores[h, i, j] = sum_d q[i,h,d] * k[j,h,d]   (batched over heads, no .T)
    scores = jax.lax.dot_general(
        q, k,
        dimension_numbers=(((2,), (2,)), ((1,), (1,))),
        preferred_element_type=jnp.float32)                             # (nh, tq, S) f32

    # Numerically-stable softmax over keys with DEFERRED normalization.
    m = jnp.max(scores, axis=-1, keepdims=True)
    e = jnp.exp(scores - m)                                             # (nh, tq, S) f32
    denom = jnp.sum(e, axis=-1, keepdims=True)                          # (nh, tq, 1) f32
    # dropout(p) is identity at inference; head_mask=None.

    # ctx[h, i, d] = sum_j e[h,i,j] * v[j,h,d], then normalize over head_dim
    # (nh*tq*d multiplies instead of nh*tq*S).
    ctx = jax.lax.dot_general(
        e.astype(compute_dtype), v,
        dimension_numbers=(((2,), (0,)), ((0,), (1,))),
        preferred_element_type=jnp.float32)                             # (nh, tq, d) f32
    ctx = ctx * pl.reciprocal(denom, approx=approx_recip)

    # Merge heads and do a single lane-dense (tq, H) store.
    ctx = jnp.transpose(ctx, (1, 0, 2)).reshape(q_block, H)
    o_ref[0] = ctx.astype(o_ref.dtype)


def dff_self_attention(hidden_states, wq, wk, wv, bq, bk, bv, *,
                       num_heads, compute_dtype=jnp.bfloat16,
                       out_dtype=None, q_block=None):
    """hidden_states: (B, S, H); wq/wk/wv: (H, H) nn.Linear (out,in); b*: (H,)."""
    B, S, H = hidden_states.shape
    assert H % num_heads == 0
    head_dim = H // num_heads
    scale = 1.0 / math.sqrt(head_dim)
    out_dtype = hidden_states.dtype if out_dtype is None else out_dtype

    # Query-tile axis: gives both v7x TensorCores work even when B == 1 and
    # bounds the (nh, tq, S) score tile. Must divide S; otherwise use one tile.
    if q_block is None or S % q_block != 0:
        q_block = S
    num_q = S // q_block

    # One-time weight preparation (done once at load time in a real model):
    # fold the attention scale into Wq/bq, fuse Q/K/V into one pre-transposed
    # (H, 3H) weight + (1, 3H) bias, cast weight to the compute dtype.
    w_fused_t = jnp.concatenate([wq * scale, wk, wv], axis=0).T.astype(compute_dtype)
    b_fused = jnp.concatenate([bq * scale, bk, bv]).reshape(1, 3 * H).astype(jnp.float32)

    # bf16 activation I/O: halves the per-step (1,S,H) DMA + double buffer.
    x = hidden_states.astype(compute_dtype)

    kernel = functools.partial(
        _dff_attention_kernel,
        num_heads=num_heads, head_dim=head_dim, q_block=q_block,
        compute_dtype=compute_dtype,
        approx_recip=(compute_dtype == jnp.bfloat16))

    # Advisory cost estimate for XLA's scheduler around the custom call.
    in_bytes = x.size * x.dtype.itemsize
    out_bytes = B * S * H * jnp.dtype(out_dtype).itemsize
    w_bytes = w_fused_t.size * w_fused_t.dtype.itemsize + b_fused.size * 4
    flops = B * num_q * (4 * S * H * H            # K/V projection
                         + 2 * q_block * H * H    # Q projection
                         + 4 * q_block * S * H)   # QK^T + PV
    cost = pl.CostEstimate(flops=int(flops),
                           transcendentals=int(B * num_heads * S * S),
                           bytes_accessed=int(in_bytes + out_bytes + w_bytes))

    def run(single_buffer_consts):
        # Constant-index blocks don't need a second pipeline buffer.
        const_kw = dict(pipeline_mode=pl.Buffered(1)) if single_buffer_consts else {}
        return pl.pallas_call(
            kernel,
            out_shape=jax.ShapeDtypeStruct((B, S, H), out_dtype),
            grid=(B, num_q),
            in_specs=[
                pl.BlockSpec((1, S, H), lambda b, qi: (b, 0, 0)),        # activations
                pl.BlockSpec((H, 3 * H), lambda b, qi: (0, 0), **const_kw),  # fused W
                pl.BlockSpec((1, 3 * H), lambda b, qi: (0, 0), **const_kw),  # fused bias
            ],
            out_specs=pl.BlockSpec((1, q_block, H), lambda b, qi: (b, qi, 0)),
            compiler_params=pltpu.CompilerParams(
                dimension_semantics=("parallel", "parallel"),
                vmem_limit_bytes=_vmem_limit_bytes(),
            ),
            cost_estimate=cost,
        )(x, w_fused_t, b_fused)

    try:
        return run(True)
    except Exception:
        # TODO(synk): fallback for jax builds that reject pl.Buffered(1) on a
        # constant block; semantics are identical, only VMEM headroom differs.
        return run(False)


def _reference(hidden_states, wq, wk, wv, bq, bk, bv, *, num_heads):
    """Pure-JAX f32 reference mirroring the PyTorch forward."""
    B, S, H = hidden_states.shape
    d = H // num_heads
    x = hidden_states.astype(jnp.float32)

    def proj(w, b):
        y = x @ w.T + b                                               # (B, S, H)
        return y.reshape(B, S, num_heads, d).transpose(0, 2, 1, 3)    # (B, nh, S, d)

    q = proj(wq, bq)
    k = proj(wk, bk)
    v = proj(wv, bv)
    scores = jnp.einsum("bhqd,bhkd->bhqk", q, k) / math.sqrt(d)
    probs = jax.nn.softmax(scores, axis=-1)
    ctx = jnp.einsum("bhqk,bhkd->bhqd", probs, v)
    return ctx.transpose(0, 2, 1, 3).reshape(B, S, H)


if __name__ == "__main__":
    # Small config: batch=2, seq=8, hidden=32, heads=4 (head_dim=8), qkv_bias=True.
    B, S, H, NH = 2, 8, 32, 4

    key = jax.random.PRNGKey(0)
    ks = jax.random.split(key, 7)
    hidden_states = jax.random.normal(ks[0], (B, S, H), dtype=jnp.float32)
    wq = 0.02 * jax.random.normal(ks[1], (H, H), dtype=jnp.float32)
    wk = 0.02 * jax.random.normal(ks[2], (H, H), dtype=jnp.float32)
    wv = 0.02 * jax.random.normal(ks[3], (H, H), dtype=jnp.float32)
    bq = 0.02 * jax.random.normal(ks[4], (H,), dtype=jnp.float32)
    bk = 0.02 * jax.random.normal(ks[5], (H,), dtype=jnp.float32)
    bv = 0.02 * jax.random.normal(ks[6], (H,), dtype=jnp.float32)

    ref = _reference(hidden_states, wq, wk, wv, bq, bk, bv, num_heads=NH)

    # Fast path: bf16 activations/weights on the MXU with f32 accumulation.
    out_bf16 = dff_self_attention(hidden_states, wq, wk, wv, bq, bk, bv,
                                  num_heads=NH, compute_dtype=jnp.bfloat16)
    out_bf16 = jax.block_until_ready(out_bf16)
    assert out_bf16.shape == (B, S, H)
    assert jnp.allclose(out_bf16.astype(jnp.float32), ref, atol=2e-2, rtol=2e-2), \
        "bf16 path mismatch vs reference"

    # f32 compute path (exact reciprocal) for tight semantic verification.
    out_f32 = dff_self_attention(hidden_states, wq, wk, wv, bq, bk, bv,
                                 num_heads=NH, compute_dtype=jnp.float32)
    out_f32 = jax.block_until_ready(out_f32)
    assert jnp.allclose(out_f32, ref, atol=2e-3, rtol=2e-3), \
        "f32 path mismatch vs reference"

    # Multi-query-tile grid path (B=1, two q-tiles) to exercise the q-tile axis.
    B2, S2 = 1, 16
    h2 = jax.random.normal(jax.random.PRNGKey(1), (B2, S2, H), dtype=jnp.float32)
    ref2 = _reference(h2, wq, wk, wv, bq, bk, bv, num_heads=NH)
    out2 = dff_self_attention(h2, wq, wk, wv, bq, bk, bv, num_heads=NH,
                              compute_dtype=jnp.float32, q_block=8)
    out2 = jax.block_until_ready(out2)
    assert out2.shape == (B2, S2, H)
    assert jnp.allclose(out2, ref2, atol=2e-3, rtol=2e-3), \
        "q-tiled path mismatch vs reference"

    print("KERNEL_OK")
</pallas_src>

<mosaic_0001>
module attributes {stable_mosaic.version = 11 : i64} {
  func.func @_dff_attention_kernel(%arg0: i32, %arg1: i32, %arg2: memref<1x8x32xbf16, #tpu.memory_space<vmem>>, %arg3: memref<32x96xbf16, #tpu.memory_space<vmem>>, %arg4: memref<1x96xf32, #tpu.memory_space<vmem>>, %arg5: memref<1x8x32xf32, #tpu.memory_space<vmem>>) attributes {dimension_semantics = [#tpu.dimension_semantics<parallel>, #tpu.dimension_semantics<parallel>], iteration_bounds = array<i64: 2, 1>, scalar_prefetch = 0 : i64, scratch_operands = 0 : i64, tpu.core_type = #tpu.core_type<tc>, window_params = [{transform_indices = @transform_0, window_bounds = array<i64: 1, 8, 32>}, {pipeline_mode = #tpu.pipeline_mode<synchronous>, transform_indices = @transform_1, window_bounds = array<i64: 32, 96>}, {pipeline_mode = #tpu.pipeline_mode<synchronous>, transform_indices = @transform_2, window_bounds = array<i64: 1, 96>}, {transform_indices = @transform_3, window_bounds = array<i64: 1, 8, 32>}]} {
    %c0 = arith.constant 0 : index
    %c0_0 = arith.constant 0 : index
    %c0_1 = arith.constant 0 : index
    %0 = vector.load %arg2[%c0, %c0_0, %c0_1] : memref<1x8x32xbf16, #tpu.memory_space<vmem>>, vector<1x8x32xbf16>
    %1 = vector.shape_cast %0 : vector<1x8x32xbf16> to vector<8x32xbf16>
    %c0_2 = arith.constant 0 : index
    %c32 = arith.constant 32 : index
    %2 = vector.load %arg3[%c0_2, %c32] : memref<32x96xbf16, #tpu.memory_space<vmem>>, vector<32x64xbf16>
    %cst = arith.constant dense<0.000000e+00> : vector<8x64xf32>
    %3 = tpu.matmul %1, %2, %cst {dimension_numbers = #tpu.dot_dimension_numbers<[1], [0], [0], [1], [0, 0, 1, 1], [], []>} : vector<8x32xbf16>, vector<32x64xbf16>, vector<8x64xf32> -> vector<8x64xf32>
    %c0_3 = arith.constant 0 : index
    %c32_4 = arith.constant 32 : index
    %4 = vector.load %arg4[%c0_3, %c32_4] : memref<1x96xf32, #tpu.memory_space<vmem>>, vector<1x64xf32>
    %5 = vector.broadcast %4 : vector<1x64xf32> to vector<8x64xf32>
    %6 = arith.addf %3, %5 : vector<8x64xf32>
    %7 = vector.extract_strided_slice %6 {offsets = [0, 0], sizes = [8, 32], strides = [1, 1]} : vector<8x64xf32> to vector<8x32xf32>
    %8 = vector.shape_cast %7 : vector<8x32xf32> to vector<8x4x8xf32>
    %9 = arith.truncf %8 : vector<8x4x8xf32> to vector<8x4x8xbf16>
    %10 = vector.extract_strided_slice %6 {offsets = [0, 32], sizes = [8, 32], strides = [1, 1]} : vector<8x64xf32> to vector<8x32xf32>
    %11 = vector.shape_cast %10 : vector<8x32xf32> to vector<8x4x8xf32>
    %12 = arith.truncf %11 : vector<8x4x8xf32> to vector<8x4x8xbf16>
    %c8_i32 = arith.constant 8 : i32
    %13 = arith.muli %arg1, %c8_i32 : i32
    %14 = tpu.assume_multiple %13, 8 : i32
    %c0_5 = arith.constant 0 : index
    %15 = arith.index_cast %14 : i32 to index
    %c0_6 = arith.constant 0 : index
    %16 = vector.load %arg2[%c0_5, %15, %c0_6] : memref<1x8x32xbf16, #tpu.memory_space<vmem>>, vector<1x8x32xbf16>
    %17 = vector.shape_cast %16 : vector<1x8x32xbf16> to vector<8x32xbf16>
    %c0_7 = arith.constant 0 : index
    %c0_8 = arith.constant 0 : index
    %18 = vector.load %arg3[%c0_7, %c0_8] : memref<32x96xbf16, #tpu.memory_space<vmem>>, vector<32x32xbf16>
    %cst_9 = arith.constant dense<0.000000e+00> : vector<8x32xf32>
    %19 = tpu.matmul %17, %18, %cst_9 {dimension_numbers = #tpu.dot_dimension_numbers<[1], [0], [0], [1], [0, 0, 1, 1], [], []>} : vector<8x32xbf16>, vector<32x32xbf16>, vector<8x32xf32> -> vector<8x32xf32>
    %c0_10 = arith.constant 0 : index
    %c0_11 = arith.constant 0 : index
    %20 = vector.load %arg4[%c0_10, %c0_11] : memref<1x96xf32, #tpu.memory_space<vmem>>, vector<1x32xf32>
    %21 = vector.broadcast %20 : vector<1x32xf32> to vector<8x32xf32>
    %22 = arith.addf %19, %21 : vector<8x32xf32>
    %23 = vector.shape_cast %22 : vector<8x32xf32> to vector<8x4x8xf32>
    %24 = arith.truncf %23 : vector<8x4x8xf32> to vector<8x4x8xbf16>
    %cst_12 = arith.constant dense<0.000000e+00> : vector<4x8x8xf32>
    %25 = tpu.matmul %24, %9, %cst_12 {dimension_numbers = #tpu.dot_dimension_numbers<[2], [2], [0], [0], [0, 1, 0, 0, 1, 0], [1], [1]>} : vector<8x4x8xbf16>, vector<8x4x8xbf16>, vector<4x8x8xf32> -> vector<4x8x8xf32>
    %cst_13 = arith.constant dense<0xFF800000> : vector<4x8xf32>
    %26 = vector.multi_reduction <maximumf>, %25, %cst_13 [2] : vector<4x8x8xf32> to vector<4x8xf32>
    %27 = vector.shape_cast %26 : vector<4x8xf32> to vector<4x8x1xf32>
    %28 = vector.broadcast %27 : vector<4x8x1xf32> to vector<4x8x8xf32>
    %29 = arith.subf %25, %28 : vector<4x8x8xf32>
    %30 = math.exp %29 : vector<4x8x8xf32>
    %cst_14 = arith.constant dense<0.000000e+00> : vector<4x8xf32>
    %31 = vector.multi_reduction <add>, %30, %cst_14 [2] : vector<4x8x8xf32> to vector<4x8xf32>
    %32 = vector.shape_cast %31 : vector<4x8xf32> to vector<4x8x1xf32>
    %33 = arith.truncf %30 : vector<4x8x8xf32> to vector<4x8x8xbf16>
    %cst_15 = arith.constant dense<0.000000e+00> : vector<4x8x8xf32>
    %34 = tpu.matmul %33, %12, %cst_15 {dimension_numbers = #tpu.dot_dimension_numbers<[2], [0], [1], [2], [0, 0, 0, 1, 1, 2], [0], [1]>} : vector<4x8x8xbf16>, vector<8x4x8xbf16>, vector<4x8x8xf32> -> vector<4x8x8xf32>
    %35 = tpu.reciprocal %32 {approx = true} : vector<4x8x1xf32> -> vector<4x8x1xf32>
    %36 = vector.broadcast %35 : vector<4x8x1xf32> to vector<4x8x8xf32>
    %37 = arith.mulf %34, %36 : vector<4x8x8xf32>
    %38 = tpu.transpose %37, [1, 0, 2] : vector<4x8x8xf32> -> vector<8x4x8xf32>
    %39 = vector.shape_cast %38 : vector<8x4x8xf32> to vector<8x32xf32>
    %c0_16 = arith.constant 0 : index
    %c0_17 = arith.constant 0 : index
    %c0_18 = arith.constant 0 : index
    %40 = vector.load %arg5[%c0_16, %c0_17, %c0_18] : memref<1x8x32xf32, #tpu.memory_space<vmem>>, vector<1x8x32xf32>
    %41 = vector.shape_cast %40 : vector<1x8x32xf32> to vector<8x32xf32>
    %42 = vector.shape_cast %39 : vector<8x32xf32> to vector<1x8x32xf32>
    tpu.vector_store %arg5[%c0_16, %c0_17, %c0_18], %42 {strides = array<i32>} : memref<1x8x32xf32, #tpu.memory_space<vmem>>, vector<1x8x32xf32>,
    return
  }
  func.func @transform_0(%arg0: i32, %arg1: i32) -> (i32, i32, i32) {
    %c0_i32 = arith.constant 0 : i32
    %c0_i32_0 = arith.constant 0 : i32
    %c0_i32_1 = arith.constant 0 : i32
    return %arg0, %c0_i32, %c0_i32_0 : i32, i32, i32
  }
  func.func @transform_1(%arg0: i32, %arg1: i32) -> (i32, i32) {
    %c0_i32 = arith.constant 0 : i32
    %c0_i32_0 = arith.constant 0 : i32
    %c0_i32_1 = arith.constant 0 : i32
    return %c0_i32, %c0_i32_0 : i32, i32
  }
  func.func @transform_2(%arg0: i32, %arg1: i32) -> (i32, i32) {
    %c0_i32 = arith.constant 0 : i32
    %c0_i32_0 = arith.constant 0 : i32
    %c0_i32_1 = arith.constant 0 : i32
    return %c0_i32, %c0_i32_0 : i32, i32
  }
  func.func @transform_3(%arg0: i32, %arg1: i32) -> (i32, i32, i32) {
    %c0_i32 = arith.constant 0 : i32
    %c0_i32_0 = arith.constant 0 : i32
    return %arg0, %arg1, %c0_i32 : i32, i32, i32
  }
}

module attributes {stable_mosaic.version = 11 : i64} {
  func.func @_dff_attention_kernel(%arg0: i32, %arg1: i32, %arg2: memref<1x8x32xbf16, #tpu.memory_space<vmem>>, %arg3: memref<32x96xbf16, #tpu.memory_space<vmem>>, %arg4: memref<1x96xf32, #tpu.memory_space<vmem>>, %arg5: memref<1x8x32xf32, #tpu.memory_space<vmem>>) attributes {dimension_semantics = [#tpu.dimension_semantics<parallel>, #tpu.dimension_semantics<parallel>], iteration_bounds = array<i64: 2, 1>, scalar_prefetch = 0 : i64, scratch_operands = 0 : i64, tpu.core_type = #tpu.core_type<tc>, window_params = [{transform_indices = @transform_0, window_bounds = array<i64: 1, 8, 32>}, {pipeline_mode = #tpu.pipeline_mode<synchronous>, transform_indices = @transform_1, window_bounds = array<i64: 32, 96>}, {pipeline_mode = #tpu.pipeline_mode<synchronous>, transform_indices = @transform_2, window_bounds = array<i64: 1, 96>}, {transform_indices = @transform_3, window_bounds = array<i64: 1, 8, 32>}]} {
    %c0 = arith.constant 0 : index
    %c0_0 = arith.constant 0 : index
    %c0_1 = arith.constant 0 : index
    %0 = vector.load %arg2[%c0, %c0_0, %c0_1] : memref<1x8x32xbf16, #tpu.memory_space<vmem>>, vector<1x8x32xbf16>
    %1 = vector.shape_cast %0 : vector<1x8x32xbf16> to vector<8x32xbf16>
    %c0_2 = arith.constant 0 : index
    %c32 = arith.constant 32 : index
    %2 = vector.load %arg3[%c0_2, %c32] : memref<32x96xbf16, #tpu.memory_space<vmem>>, vector<32x64xbf16>
    %cst = arith.constant dense<0.000000e+00> : vector<8x64xf32>
    %3 = tpu.matmul %1, %2, %cst {dimension_numbers = #tpu.dot_dimension_numbers<[1], [0], [0], [1], [0, 0, 1, 1], [], []>} : vector<8x32xbf16>, vector<32x64xbf16>, vector<8x64xf32> -> vector<8x64xf32>
    %c0_3 = arith.constant 0 : index
    %c32_4 = arith.constant 32 : index
    %4 = vector.load %arg4[%c0_3, %c32_4] : memref<1x96xf32, #tpu.memory_space<vmem>>, vector<1x64xf32>
    %5 = vector.broadcast %4 : vector<1x64xf32> to vector<8x64xf32>
    %6 = arith.addf %3, %5 : vector<8x64xf32>
    %7 = vector.extract_strided_slice %6 {offsets = [0, 0], sizes = [8, 32], strides = [1, 1]} : vector<8x64xf32> to vector<8x32xf32>
    %8 = vector.shape_cast %7 : vector<8x32xf32> to vector<8x4x8xf32>
    %9 = arith.truncf %8 : vector<8x4x8xf32> to vector<8x4x8xbf16>
    %10 = vector.extract_strided_slice %6 {offsets = [0, 32], sizes = [8, 32], strides = [1, 1]} : vector<8x64xf32> to vector<8x32xf32>
    %11 = vector.shape_cast %10 : vector<8x32xf32> to vector<8x4x8xf32>
    %12 = arith.truncf %11 : vector<8x4x8xf32> to vector<8x4x8xbf16>
    %c8_i32 = arith.constant 8 : i32
    %13 = arith.muli %arg1, %c8_i32 : i32
    %14 = tpu.assume_multiple %13, 8 : i32
    %c0_5 = arith.constant 0 : index
    %15 = arith.index_cast %14 : i32 to index
    %c0_6 = arith.constant 0 : index
    %16 = vector.load %arg2[%c0_5, %15, %c0_6] : memref<1x8x32xbf16, #tpu.memory_space<vmem>>, vector<1x8x32xbf16>
    %17 = vector.shape_cast %16 : vector<1x8x32xbf16> to vector<8x32xbf16>
    %c0_7 = arith.constant 0 : index
    %c0_8 = arith.constant 0 : index
    %18 = vector.load %arg3[%c0_7, %c0_8] : memref<32x96xbf16, #tpu.memory_space<vmem>>, vector<32x32xbf16>
    %cst_9 = arith.constant dense<0.000000e+00> : vector<8x32xf32>
    %19 = tpu.matmul %17, %18, %cst_9 {dimension_numbers = #tpu.dot_dimension_numbers<[1], [0], [0], [1], [0, 0, 1, 1], [], []>} : vector<8x32xbf16>, vector<32x32xbf16>, vector<8x32xf32> -> vector<8x32xf32>
    %c0_10 = arith.constant 0 : index
    %c0_11 = arith.constant 0 : index
    %20 = vector.load %arg4[%c0_10, %c0_11] : memref<1x96xf32, #tpu.memory_space<vmem>>, vector<1x32xf32>
    %21 = vector.broadcast %20 : vector<1x32xf32> to vector<8x32xf32>
    %22 = arith.addf %19, %21 : vector<8x32xf32>
    %23 = vector.shape_cast %22 : vector<8x32xf32> to vector<8x4x8xf32>
    %24 = arith.truncf %23 : vector<8x4x8xf32> to vector<8x4x8xbf16>
    %cst_12 = arith.constant dense<0.000000e+00> : vector<4x8x8xf32>
    %25 = tpu.matmul %24, %9, %cst_12 {dimension_numbers = #tpu.dot_dimension_numbers<[2], [2], [0], [0], [0, 1, 0, 0, 1, 0], [1], [1]>} : vector<8x4x8xbf16>, vector<8x4x8xbf16>, vector<4x8x8xf32> -> vector<4x8x8xf32>
    %cst_13 = arith.constant dense<0xFF800000> : vector<4x8xf32>
    %26 = vector.multi_reduction <maximumf>, %25, %cst_13 [2] : vector<4x8x8xf32> to vector<4x8xf32>
    %27 = vector.shape_cast %26 : vector<4x8xf32> to vector<4x8x1xf32>
    %28 = vector.broadcast %27 : vector<4x8x1xf32> to vector<4x8x8xf32>
    %29 = arith.subf %25, %28 : vector<4x8x8xf32>
    %30 = math.exp %29 : vector<4x8x8xf32>
    %cst_14 = arith.constant dense<0.000000e+00> : vector<4x8xf32>
    %31 = vector.multi_reduction <add>, %30, %cst_14 [2] : vector<4x8x8xf32> to vector<4x8xf32>
    %32 = vector.shape_cast %31 : vector<4x8xf32> to vector<4x8x1xf32>
    %33 = arith.truncf %30 : vector<4x8x8xf32> to vector<4x8x8xbf16>
    %cst_15 = arith.constant dense<0.000000e+00> : vector<4x8x8xf32>
    %34 = tpu.matmul %33, %12, %cst_15 {dimension_numbers = #tpu.dot_dimension_numbers<[2], [0], [1], [2], [0, 0, 0, 1, 1, 2], [0], [1]>} : vector<4x8x8xbf16>, vector<8x4x8xbf16>, vector<4x8x8xf32> -> vector<4x8x8xf32>
    %35 = tpu.reciprocal %32 {approx = true} : vector<4x8x1xf32> -> vector<4x8x1xf32>
    %36 = vector.broadcast %35 : vector<4x8x1xf32> to vector<4x8x8xf32>
    %37 = arith.mulf %34, %36 : vector<4x8x8xf32>
    %38 = tpu.transpose %37, [1, 0, 2] : vector<4x8x8xf32> -> vector<8x4x8xf32>
    %39 = vector.shape_cast %38 : vector<8x4x8xf32> to vector<8x32xf32>
    %c0_16 = arith.constant 0 : index
    %c0_17 = arith.constant 0 : index
    %c0_18 = arith.constant 0 : index
    %40 = vector.load %arg5[%c0_16, %c0_17, %c0_18] : memref<1x8x32xf32, #tpu.memory_space<vmem>>, vector<1x8x32xf32>
    %41 = vector.shape_cast %40 : vector<1x8x32xf32> to vector<8x32xf32>
    %42 = vector.shape_cast %39 : vector<8x32xf32> to vector<1x8x32xf32>
    tpu.vector_store %arg5[%c0_16, %c0_17, %c0_18], %42 {strides = array<i32>} : memref<1x8x32xf32, #tpu.memory_space<vmem>>, vector<1x8x32xf32>,
    return
  }
  func.func @transform_0(%arg0: i32, %arg1: i32) -> (i32, i32, i32) {
    %c0_i32 = arith.constant 0 : i32
    %c0_i32_0 = arith.constant 0 : i32
    %c0_i32_1 = arith.constant 0 : i32
    return %arg0, %c0_i32, %c0_i32_0 : i32, i32, i32
  }
  func.func @transform_1(%arg0: i32, %arg1: i32) -> (i32, i32) {
    %c0_i32 = arith.constant 0 : i32
    %c0_i32_0 = arith.constant 0 : i32
    %c0_i32_1 = arith.constant 0 : i32
    return %c0_i32, %c0_i32_0 : i32, i32
  }
  func.func @transform_2(%arg0: i32, %arg1: i32) -> (i32, i32) {
    %c0_i32 = arith.constant 0 : i32
    %c0_i32_0 = arith.constant 0 : i32
    %c0_i32_1 = arith.constant 0 : i32
    return %c0_i32, %c0_i32_0 : i32, i32
  }
  func.func @transform_3(%arg0: i32, %arg1: i32) -> (i32, i32, i32) {
    %c0_i32 = arith.constant 0 : i32
    %c0_i32_0 = arith.constant 0 : i32
    return %arg0, %arg1, %c0_i32 : i32, i32, i32
  }
}

</mosaic_0001>

<bundles_post_ra>
// kernel: tpu_custom_call.1
= control target key start
LH: loop header
LB: loop body
LE: loop exit
PB: predicated region body
PF: predicated region fallthrough
CT: control target
= control target key end

     0   :  { %8 = vsyncpa [#allocation3], 0  ;;  %s2220_s0 = inlined_call_operand.hbm [shape: bf16[2,8,32], index: 0, kind: input, shape index: {}]   ;;  %s2221_s1 = inlined_call_operand.hbm [shape: bf16[32,96], index: 1, kind: input, shape index: {}]   ;;  %s2222_s2 = inlined_call_operand.vmem [shape: f32[1,96], index: 2, kind: input, shape index: {}]   ;;  %s2223_s3 = inlined_call_operand.hbm [shape: f32[2,8,32], index: 3, kind: output, shape index: {}]  }
   0x1   :  { %10 = vsyncpa [#allocation3 + $0x1], 0 }
   0x2   :  { %11 = vsyncpa [#allocation6], 0 }
   0x3   :  { %12 = vsyncpa [#allocation4], 0 }
   0x4   :  { %14 = vsyncpa [#allocation4 + $0x1], 0  ;;  %s1837_s12 = smov 0   ;;  %s1839_s13 = smov 0  }
   0x5   :  { %s1841_s14 = smov 0   ;;  %s1843_s15 = smov 0  }
   0x6   :  { %s1845_s16 = smov 0   ;;  %s1847_s17 = smov 0  }
   0x7 LB: > { %s1470_s18 = sadd.s32 4294967295, %s1803_s17   ;;  %p1472_p0 = scmp.ge.s32.totalorder %s1803_s17, 1  ;;  %s1803_s17 = sphi %s1847_s17, %s20_s17   ;;  %s1799_s16 = sphi %s1845_s16, %s2234_s16   ;;  %s1795_s15 = sphi %s1843_s15, %s2233_s15   ;;  %s1791_s14 = sphi %s1841_s14, %s2232_s14   ;;  %s1787_s13 = sphi %s1839_s13, %s2231_s13   ;;  %s1783_s12 = sphi %s1837_s12, %s2230_s12  }
   0x8   : > { %p1869_p1 = scmp.eq.s32.totalorder %s1470_s18, 0  ;;  %p133_p2 = scmp.lt.s32.totalorder %s1803_s17, 3 }
   0x9   : > { %s144_s22 = sshll.u32 %s2221_s1, 4  ;;  %s1805_s24 = smov [#allocation5]   ;;  %s145_s22 = int_to_ptr.hbm [resolvable:$true] %s144_s22 }
   0xa   : > { %p1877_p3 = pnand %p1472_p0, %p133_p2  ;;  %s146_s25 = sshll.u32 %s1805_s24, 4  ;;  %s147_s25 = int_to_ptr.vmem [resolvable:$true] %s146_s25 }
   0xb   : > { %p1474_p6 = scmp.ge.s32.totalorder %s1803_s17, 2  ;;  %s1806_s26 = smov 64  }
   0xc   : > { %p1523_p4 = pneg %p1877_p3  ;;  %s1807_s27 = smov 4  }
   0xd   : > { %s1471_s28 = sadd.s32 4294967294, %s1803_s17   ;;  %s32_s29 = sadd.s32 1, %s1799_s16 }
   0xe   : > { %p1524_p5 = pnand %p1523_p4, %p1869_p1  ;;  %s39_s30 = sadd.s32 1, %s1791_s14 }
   0xf   : > { %p34_p7 = scmp.ge.s32.totalorder %s32_s29, 2  ;;  %p46_p8 = scmp.ne.s32.totalorder %s1791_s14, %s1787_s13 }
  0x10   : > { %1526 = dma.hbm_to_vmem [thread:$0]  (!%p1524_p5), %s145_s22, 256, %s147_s25, [#allocation6], %s1806_s26, %s1806_s26, %s1807_s27  }
  0x11   : > { %p47_p9 = scmp.eq.s32.totalorder %s1803_s17, 0  ;;  %p52_p10 = scmp.ne.s32.totalorder %s1787_s13, %s1783_s12 }
  0x12   : > { %s2236_s29 = smov (%p34_p7, %s32_s29), 0  ;;  %p120_p13 = scmp.eq.s32.totalorder %s1470_s18, 1 }
  0x13   : > { %p1896_p11 = por %p47_p9, %p46_p8  ;;  %p1902_p12 = por %p1869_p1, %p52_p10 }
  0x14   : > { %s36_s6 = ssub.s32 %s1799_s16, %s2236_s29  ;;  %p126_p2 = scmp.eq.s32.totalorder %s1471_s28, 1 }
  0x15   : > { %p37_p0 = scmp.eq.s32.totalorder %s36_s6, 0  ;;  %p1908_p4 = por %p120_p13, %p46_p8 }
  0x16   : > { %p1536_p5 = scmp.lt.s32.totalorder %s1803_s17, 2  ;;  %p1916_p7 = por %p126_p2, %p52_p10 }
  0x17   : > { %s1914_s8 = scalar_select %p37_p0, %s1791_s14, %s39_s30  }
  0x18   : > { %s163_s10 = sand.u32 1, %s1791_s14   ;;  %s1476_s20 = sshll.u32 %s1799_s16, 2 }
  0x19   : > { %s1475_s11 = sshll.u32 %s163_s10, 2  ;;  %s171_s18 = scalar_lea.hbm %s2220_s0, %s1476_s20 }
  0x1a   : > { %s167_s24 = scalar_lea.vmem [#allocation2], %s1475_s11  ;;  %s173_s26 = sshll.u32 %s171_s18, 4  ;;  %s174_s26 = int_to_ptr.hbm [resolvable:$true] %s173_s26 }
  0x1b   : > { %s175_s25 = sshll.u32 %s167_s24, 4  ;;  %p1528_p8 = pnand %p1536_p5, %p1896_p11  ;;  %s176_s25 = int_to_ptr.vmem [resolvable:$true] %s175_s25 }
  0x1c   : > { %s164_s27 = scalar_lea.sflag [#allocation3], %s163_s10  ;;  %184 = sbr.rel (%p1877_p3) target bundleno = 1444 (0x5a4), region = 32 }
  0x1d   : > { %1530 = dma.hbm_to_vmem [thread:$0]  (!%p1528_p8), %s174_s26, 64, %s176_s25, %s164_s27  }
  0x1e   : > { %s1930_s28 = sand.u32 (!%p1877_p3), 1, %s1787_s13  }
  0x1f   : > { %s1478_s30 = sshll.u32 (!%p1877_p3), %s1930_s28, 2  ;;  %s187_s6 = scalar_lea.sflag (!%p1877_p3), [#allocation3], %s1930_s28 }
  0x20   : > { %s190_s11 = scalar_lea.vmem (!%p1877_p3), [#allocation2], %s1478_s30 }
  0x21   : > { %1770 = dma.done.wait (%p1902_p12), %s187_s6, 64  }
  0x22   : > { %1772 = vsyncadd (%p1902_p12), %s187_s6, 4294967232 }
  0x23   : > { %1774 = dma.done.wait (%p1869_p1), [#allocation6], 256  }
  0x24   : > { %1776 = vsyncadd (%p1869_p1), [#allocation6], 4294967040  ;;  %v1512_v0 = vld [vmem:[#allocation5 + $0x8] sm:$0xff]  ;;  %s1808_s23 = smov 96   ;;  %v1511_v2 = vld [vmem:[#allocation5] sm:$0xff]  ;;  %vm247_vm0 = vcmask 261120  }
  0x25   : > { %v1514_v1 = vld [vmem:[#allocation5 + $0x8] sm:$0xff]  ;;  %240 = vrot.lane.b32.xlu0 %v1512_v0, %s1808_s23  ;;  %v1513_v3 = vld [vmem:[#allocation5] sm:$0xff]  ;;  %v420_v4 = vld [vmem:[%s190_s11] sm:$0xf]  ;;  %s1809_s20 = smov 104   ;;  %s1810_s21 = smov 120  }
  0x26   : > { %450 = vmatpush.bf16.msra.mxu1 %v1514_v1  ;;  %v1639_v5 = vld [vmem:[%s2222_s2] ss:$0 sm:$0xff]  ;;  %s1811_s22 = smov 112   ;;  %v1812_v19 = vmov 1983009808   ;;  %vm275_vm1 = vcmask 1047556  }
  0x27   : > { %244 = vrot.lane.b32.xlu1 %v1639_v5, %s1808_s23  ;;  %v220_v8 = vld [vmem:[%s190_s11] sm:$0xf]  ;;  %v280_v20 = vunpack.c.l.s4 %v1812_v19  ;;  %v1813_v33 = vmov 1934713408   ;;  %vm984_vm2 = vcmask 1043456   ;;  %vm980_vm3 = vcmask 64512  }
  0x28   : > { %v1640_v11 = vld [vmem:[%s2222_s2] ss:$0 sm:$0xff]  ;;  %v304_v34 = vunpack.c.l.s4 %v1813_v33  ;;  %s1814_s18 = smov 16   ;;  %s1815_s24 = smov 8   ;;  %vm1357_vm4 = vcmask 130048   ;;  %vm1359_vm5 = vcmask 195584  }
  0x29   : > { %v1964_v23 = vunpack.c.0.s8 %v280_v20  ;;  %s1816_s25 = smov 24   ;;  %s1480_s26 = sshll.u32 %s1930_s28, 3 }
  0x2a   : > { %451 = vmatpush.bf16.msra.mxu1 %v1513_v3  ;;  %v1982_v41 = vunpack.c.0.s8 %v304_v34  ;;  %s1508_s27 = sshll.u32 %s1795_s15, 3  ;;  %s1363_s15 = scalar_lea.sflag [#allocation4], %s1930_s28 }
  0x2b   : > { %s1374_s11 = scalar_lea.hbm %s2223_s3, %s1508_s27 }
  0x2c   : > { %s1378_s5 = sshll.u32 %s1374_s11, 4  ;;  %s1379_s5 = int_to_ptr.hbm [resolvable:$true] %s1378_s5 }
  0x2d   : > { %238 = vrot.lane.b32.xlu0 %v1511_v2, %s1808_s23  ;;  %1498 = vmatmul.msk.bf16.vlgmr.msra.gmra.mxu1 %vm247_vm0, %v420_v4  ;;  %s1731_s19 = sshra.s32 %s1379_s5, 4  ;;  %s1732_s19 = int_to_ptr.hbm [resolvable:$true] %s1731_s19 }
  0x2e   : > { %s1733_s10 = scalar_lea.hbm %s1732_s19, 8  ;;  %p1738_p10 = scmp.lt.s32.totalorder %s1732_s19, %s2223_s3 }
  0x2f   : > { %p1734_p1 = scmp.ne.s32.totalorder %s1732_s19, %s1733_s10 }
  0x31   : > { %p1735_p3 = pnand %p1734_p1, %p1908_p4 }
  0x33   : > { %p1736_p9 = pneg %p1735_p3 }
  0x97   : > { %v241_v6 = vpop.permute.xlu0 %240 }
  0x98   : > { %257 = vmatpush.bf16.msra.mxu0 %v241_v6 }
  0x99   : > { %v245_v12 = vpop.permute.xlu1 %244 }
  0x9f   : > { %v239_v7 = vpop.permute.xlu0 %238 }
  0xa0   : > { %258 = vmatpush.bf16.msra.mxu0 %v239_v7 }
  0xa3   : > { %1489 = vmatmul.msk.bf16.vlgmr.msra.gmra.mxu0 %vm247_vm0, %v220_v8 }
  0xaa   : > { %v453_v9 = vpop.f32.mrf.mxu1 }
  0xab   : > { %v1953_v13 = vadd.f32 %v1640_v11, %v453_v9 }
  0xb2   : > { %v455_v10 = vpop.f32.mrf.mxu1 }
 0x120   : > { %v260_v14 = vpop.f32.mrf.mxu0 }
 0x121   : > { %v1955_v15 = vadd.f32 %v260_v14, %v245_v12 }
 0x123   : > { %271 = vrot.lane.b32.xlu2 %v1955_v15, %s1809_s20  ;;  %v1600_v16 = vpack.i.bf16 %v1953_v13, %v1955_v15  ;;  %v277_v22 = vrot.slane %v1955_v15, 4 }
 0x125   : > { %1601 = vrot.lane.b32.xlu1 %v1600_v16, %s1810_s21 }
 0x128   : > { %v262_v17 = vpop.f32.mrf.mxu0 }
 0x12b   : > { %268 = vrot.lane.b32.xlu2 %v1955_v15, %s1811_s22 }
 0x17d   : > { %v272_v18 = vpop.permute.xlu2 %271 }
 0x17e   : > { %v287_v27 = vrot.slane %v272_v18, 4 }
 0x185   : > { %v269_v21 = vpop.permute.xlu2 %268 }
 0x186   : > { %v274_v24 = vrot.slane %v269_v21, 4  ;;  %v278_v25 = vsel %vm275_vm1, %v269_v21, %v277_v22  ;;  %v1634_v4 = vpack.i.bf16 %v272_v18, %v269_v21 }
 0x187   : > { %v286_v29 = vperm.slane %v278_v25, %v1964_v23 }
 0x188   : > { %v276_v30 = vsel %vm275_vm1, %v274_v24, %v1955_v15 }
 0x189   : > { %v282_v37 = vperm.slane %v276_v30, %v1964_v23  ;;  %v313_v38 = vrot.slane %v286_v29, 4 }
 0x18b   : > { %v301_v59 = vrot.slane %v282_v37, 4 }
 0x197   : > { %v1967_v26 = vpop.permute.xlu1 %1601 }
 0x198   : > { %v1970_v28 = vunpack.i.l.bf16 %v1967_v26 }
 0x19a   : > { %v288_v31 = vsel %vm275_vm1, %v287_v27, %v1970_v28  ;;  %v289_v32 = vrot.slane %v1970_v28, 4 }
 0x19b   : > { %v294_v35 = vperm.slane %v288_v31, %v1964_v23 }
 0x19c   : > { %v290_v36 = vsel %vm275_vm1, %v272_v18, %v289_v32 }
 0x19d   : > { %v299_v39 = vrot.slane %v294_v35, 4  ;;  %v298_v40 = vperm.slane %v290_v36, %v1964_v23  ;;  %v302_v62 = vsel %vm275_vm1, %v294_v35, %v301_v59 }
 0x19e   : > { %v310_v63 = vperm.slane %v302_v62, %v1982_v41 }
 0x19f   : > { %v300_v42 = vsel %vm275_vm1, %v299_v39, %v282_v37  ;;  %v314_v43 = vsel %vm275_vm1, %v298_v40, %v313_v38  ;;  %v311_v44 = vrot.slane %v298_v40, 4 }
 0x1a0   : > { %v306_v45 = vperm.slane %v300_v42, %v1982_v41  ;;  %v322_v46 = vperm.slane %v314_v43, %v1982_v41  ;;  %v325_v0 = vrot.slane %v310_v63, 4  ;;  %v333_v2 = vpack.c.bf16 %v310_v63, %v310_v63 }
 0x1a1   : > { %v312_v47 = vsel %vm275_vm1, %v311_v44, %v286_v29 }
 0x1a2   : > { %v323_v48 = vrot.slane %v306_v45, 4  ;;  %v329_v49 = vrot.slane %v322_v46, 4  ;;  %v318_v50 = vperm.slane %v312_v47, %v1982_v41  ;;  %v331_v53 = vpack.c.bf16 %v306_v45, %v306_v45 }
 0x1a3   : > { %v337_v57 = vpack.c.bf16 %v322_v46, %v322_v46  ;;  %v326_v1 = vsel %vm275_vm1, 0.0, %v325_v0 }
 0x1a4   : > { %v324_v51 = vsel %vm275_vm1, 0.0, %v323_v48  ;;  %v330_v52 = vsel %vm275_vm1, 0.0, %v329_v49  ;;  %v327_v56 = vrot.slane %v318_v50, 4  ;;  %v335_v60 = vpack.c.bf16 %v318_v50, %v318_v50 }
 0x1a5   : > { %v332_v54 = vpack.c.bf16 %v324_v51, %v324_v51  ;;  %v338_v55 = vpack.c.bf16 %v330_v52, %v330_v52  ;;  %v334_v3 = vpack.c.bf16 %v326_v1, %v326_v1 }
 0x1a6   : > { %v328_v58 = vsel %vm275_vm1, 0.0, %v327_v56 }
 0x1a7   : > { %1611 = vxpose.binary.xlu1.c.b16.start.end [1/2] (short) (narrow) %v332_v54, %v331_v53, 16  ;;  %v336_v61 = vpack.c.bf16 %v328_v58, %v328_v58 }
 0x1a8   : > { %1605 = vxpose.binary.xlu2.c.b16.start.end [1/2] (short) (narrow) %v338_v55, %v337_v57, 16 }
 0x1a9   : > { %1608 = vxpose.binary.xlu0.c.b16.start.end [1/2] (short) (narrow) %v336_v61, %v335_v60, 16 }
 0x1b9   : > { %1614 = vxpose.binary.xlu0.c.b16.start.end [1/2] (short) (narrow) %v334_v3, %v333_v2, 16  ;;  %v1629_v3 = vpack.i.bf16 %v1970_v28, %v1955_v15 }
 0x211   : > { %461 = vrot.lane.b32.xlu2 %v1953_v13, %s1811_s22  ;;  %s1737_s22 = scalar_lea.hbm %s2223_s3, 16 }
 0x212   : > { %p1739_p11 = scmp.lt.s32.totalorder %s1737_s22, %s1733_s10 }
 0x214   : > { %p1740_p12 = por %p1739_p11, %p1738_p10 }
 0x216   : > { %p1741_p13 = pnand %p1740_p12, %p1736_p9 }
 0x219   : > { %1635 = vrot.lane.b32.xlu2 %v1634_v4, %s1808_s23 }
 0x227   : > { %464 = vrot.lane.b32.xlu0 %v1953_v13, %s1809_s20 }
 0x249   : > { %v1606_v8 = vpop.trf.xlu2 }
 0x24a   : > { %v718_v10 = vrot.slane %v1606_v8, 4  ;;  %v469_v8 = vrot.slane %v1953_v13, 4 }
 0x251   : > { %v1607_v20 = vpop.trf.xlu2 }
 0x252   : > { %v746_v22 = vrot.slane %v1607_v20, 4 }
 0x253   : > { %v1612_v6 = vpop.trf.xlu1 }
 0x255   : > { %v1609_v5 = vpop.trf.xlu0 }
 0x256   : > { %v712_v9 = vrot.slane %v1609_v5, 4 }
 0x258   : > { %v713_v11 = vsel %vm275_vm1, %v712_v9, %v1612_v6  ;;  %v1604_v6 = vunpack.i.h.bf16 %v1967_v26 }
 0x259   : > { %v717_v18 = vperm.slane %v713_v11, %v1964_v23 }
 0x25a   : > { %v481_v11 = vrot.slane %v1604_v6, 4 }
 0x25b   : > { %v1613_v14 = vpop.trf.xlu1  ;;  %v726_v24 = vrot.slane %v717_v18, 4 }
 0x25d   : > { %v1610_v7 = vpop.trf.xlu0 }
 0x25e   : > { %v740_v12 = vrot.slane %v1610_v7, 4 }
 0x260   : > { %v741_v19 = vsel %vm275_vm1, %v740_v12, %v1613_v14 }
 0x261   : > { %v745_v25 = vperm.slane %v741_v19, %v1964_v23 }
 0x263   : > { %v754_v31 = vrot.slane %v745_v25, 4 }
 0x265   : > { %v1615_v16 = vpop.trf.xlu0 }
 0x266   : > { %v719_v17 = vsel %vm275_vm1, %v718_v10, %v1615_v16 }
 0x267   : > { %v723_v21 = vperm.slane %v719_v17, %v1964_v23 }
 0x269   : > { %v727_v27 = vsel %vm275_vm1, %v723_v21, %v726_v24  ;;  %v724_v36 = vrot.slane %v723_v21, 4 }
 0x26a   : > { %v735_v33 = vperm.slane %v727_v27, %v1982_v41 }
 0x26b   : > { %v725_v42 = vsel %vm275_vm1, %v724_v36, %v717_v18  ;;  %v462_v7 = vpop.permute.xlu2 %461 }
 0x26c   : > { %v788_v39 = vshrl.u32 %v735_v33, 16  ;;  %v731_v46 = vperm.slane %v725_v42, %v1982_v41  ;;  %v738_v56 = vrot.slane %v735_v33, 4  ;;  %v467_v10 = vrot.slane %v462_v7, 4 }
 0x26d   : > { %v1616_v29 = vpop.trf.xlu0  ;;  %v470_v12 = vsel %vm275_vm1, %v462_v7, %v469_v8 }
 0x26e   : > { %v747_v30 = vsel %vm275_vm1, %v746_v22, %v1616_v29  ;;  %v736_v48 = vrot.slane %v731_v46, 4  ;;  %v739_v58 = vsel %vm275_vm1, 0, %v738_v56  ;;  %v772_v0 = vshrl.u32 %v731_v46, 16 }
 0x26f   : > { %v751_v32 = vperm.slane %v747_v30, %v1964_v23  ;;  %v796_v60 = vshrl.u32 %v739_v58, 16  ;;  %v468_v28 = vsel %vm275_vm1, %v467_v10, %v1953_v13  ;;  %v478_v17 = vperm.slane %v470_v12, %v1964_v23 }
 0x270   : > { %v737_v50 = vsel %vm275_vm1, 0, %v736_v48  ;;  %v474_v19 = vperm.slane %v468_v28, %v1964_v23 }
 0x271   : > { %v752_v34 = vrot.slane %v751_v32, 4  ;;  %v755_v35 = vsel %vm275_vm1, %v751_v32, %v754_v31  ;;  %v780_v52 = vshrl.u32 %v737_v50, 16  ;;  %v505_v20 = vrot.slane %v478_v17, 4 }
 0x272   : > { %v763_v37 = vperm.slane %v755_v35, %v1982_v41  ;;  %v493_v27 = vrot.slane %v474_v19, 4 }
 0x273   : > { %v753_v38 = vsel %vm275_vm1, %v752_v34, %v745_v25 }
 0x274   : > { %v789_v40 = vshrl.u32 %v763_v37, 16  ;;  %v786_v43 = vpack.i.b16 %v763_v37, %v735_v33  ;;  %v759_v45 = vperm.slane %v753_v38, %v1982_v41  ;;  %v766_v55 = vrot.slane %v763_v37, 4 }
 0x276   : > { %v790_v44 = vpack.i.b16 %v789_v40, %v788_v39  ;;  %v764_v47 = vrot.slane %v759_v45, 4  ;;  %v767_v57 = vsel %vm275_vm1, 0, %v766_v55  ;;  %v773_v63 = vshrl.u32 %v759_v45, 16 }
 0x277   : > { %v797_v59 = vshrl.u32 %v767_v57, 16  ;;  %v794_v61 = vpack.i.b16 %v767_v57, %v739_v58  ;;  %v770_v1 = vpack.i.b16 %v759_v45, %v731_v46 }
 0x278   : > { %1617 = vxpose.binary.xlu1.c.b16.start.end [1/2] (short) (narrow) %v790_v44, %v786_v43, 16  ;;  %v765_v49 = vsel %vm275_vm1, 0, %v764_v47  ;;  %v774_v2 = vpack.i.b16 %v773_v63, %v772_v0 }
 0x279   : > { %v781_v51 = vshrl.u32 %v765_v49, 16  ;;  %v778_v53 = vpack.i.b16 %v765_v49, %v737_v50  ;;  %v798_v62 = vpack.i.b16 %v797_v59, %v796_v60 }
 0x27b   : > { %v782_v54 = vpack.i.b16 %v781_v51, %v780_v52 }
 0x288   : > { %1620 = vxpose.binary.xlu1.c.b16.start.end [1/2] (short) (narrow) %v782_v54, %v778_v53, 16 }
 0x298   : > { %1623 = vxpose.binary.xlu1.c.b16.start.end [1/2] (short) (narrow) %v798_v62, %v794_v61, 16 }
 0x299   : > { %v465_v9 = vpop.permute.xlu0 %464 }
 0x29a   : > { %v479_v16 = vrot.slane %v465_v9, 4  ;;  %v482_v15 = vsel %vm275_vm1, %v465_v9, %v481_v11 }
 0x29b   : > { %v490_v26 = vperm.slane %v482_v15, %v1964_v23 }
 0x29c   : > { %v480_v18 = vsel %vm275_vm1, %v479_v16, %v1604_v6 }
 0x29d   : > { %v486_v21 = vperm.slane %v480_v18, %v1964_v23  ;;  %v503_v24 = vrot.slane %v490_v26, 4  ;;  %v506_v25 = vsel %vm275_vm1, %v490_v26, %v505_v20 }
 0x29e   : > { %v514_v13 = vperm.slane %v506_v25, %v1982_v41 }
 0x29f   : > { %v491_v29 = vrot.slane %v486_v21, 4  ;;  %v494_v30 = vsel %vm275_vm1, %v486_v21, %v493_v27  ;;  %v504_v31 = vsel %vm275_vm1, %v503_v24, %v478_v17 }
 0x2a0   : > { %v502_v32 = vperm.slane %v494_v30, %v1982_v41  ;;  %v510_v34 = vperm.slane %v504_v31, %v1982_v41  ;;  %v521_v35 = vrot.slane %v514_v13, 4  ;;  %v529_v47 = vpack.c.bf16 %v514_v13, %v514_v13 }
 0x2a1   : > { %v492_v33 = vsel %vm275_vm1, %v491_v29, %v474_v19 }
 0x2a2   : > { %v498_v37 = vperm.slane %v492_v33, %v1982_v41  ;;  %v517_v38 = vrot.slane %v502_v32, 4  ;;  %v519_v39 = vrot.slane %v510_v34, 4  ;;  %v522_v40 = vsel %vm275_vm1, 0.0, %v521_v35 }
 0x2a3   : > { %v530_v44 = vpack.c.bf16 %v522_v40, %v522_v40  ;;  %v525_v54 = vpack.c.bf16 %v502_v32, %v502_v32  ;;  %v527_v55 = vpack.c.bf16 %v510_v34, %v510_v34  ;;  %v538_v56 = vrot.slane %v529_v47, 4 }
 0x2a4   : > { %v515_v42 = vrot.slane %v498_v37, 4  ;;  %v518_v43 = vsel %vm275_vm1, 0.0, %v517_v38  ;;  %v520_v46 = vsel %vm275_vm1, 0.0, %v519_v39  ;;  %v523_v63 = vpack.c.bf16 %v498_v37, %v498_v37 }
 0x2a5   : > { %v526_v49 = vpack.c.bf16 %v518_v43, %v518_v43  ;;  %v528_v51 = vpack.c.bf16 %v520_v46, %v520_v46  ;;  %v558_v52 = vrot.slane %v530_v44, 4  ;;  %v531_v0 = vrot.slane %v527_v55, 4 }
 0x2a6   : > { %v516_v50 = vsel %vm275_vm1, 0.0, %v515_v42 }
 0x2a7   : > { %v524_v57 = vpack.c.bf16 %v516_v50, %v516_v50  ;;  %v552_v59 = vrot.slane %v528_v51, 4  ;;  %v559_v62 = vsel %vm275_vm1, %v558_v52, %v526_v49  ;;  %v533_v12 = vsel %vm275_vm1, %v531_v0, %v523_v63  ;;  %v1636_v51 = vpop.permute.xlu2 %1635 }
 0x2a8   : > { %1626 = vxpose.binary.xlu1.c.b16.start.end [1/2] (short) (narrow) %v774_v2, %v770_v1, 16  ;;  %v539_v1 = vsel %vm275_vm1, %v538_v56, %v525_v54  ;;  %v563_v8 = vperm.slane %v559_v62, %v1964_v23  ;;  %v537_v18 = vperm.slane %v533_v12, %v1964_v23  ;;  %v1638_v54 = vunpack.i.h.bf16 %v1636_v51 }
 0x2a9   : > { %v543_v10 = vperm.slane %v539_v1, %v1964_v23  ;;  %v1637_v55 = vunpack.i.l.bf16 %v1636_v51 }
 0x2aa   : > { %v564_v15 = vrot.slane %v563_v8, 4 }
 0x2ab   : > { %v544_v26 = vrot.slane %v543_v10, 4 }
 0x2ad   : > { %v545_v25 = vsel %vm275_vm1, %v544_v26, %v537_v18 }
 0x2ae   : > { %v549_v31 = vperm.slane %v545_v25, %v1982_v41 }
 0x2b0   : > { %v575_v46 = vshrl.u32 %v549_v31, 16 }
 0x302   : > { %1630 = vrot.lane.b32.xlu1 %v1629_v3, %s1808_s23  ;;  %s218_s23 = scalar_lea.vmem [#allocation7], %s1480_s26 }
 0x303   : > { %s1376_s4 = sshll.u32 %s218_s23, 4  ;;  %s1377_s4 = int_to_ptr.vmem [resolvable:$true] %s1376_s4 }
 0x324   : > { %v2024_v4 = vpop.trf.xlu1 }
 0x325   : > { %v928_v60 = vrot.slane %v2024_v4, 4  ;;  %v553_v4 = vsel %vm275_vm1, %v552_v59, %v524_v57 }
 0x326   : > { %v557_v16 = vperm.slane %v553_v4, %v1964_v23 }
 0x328   : > { %v565_v24 = vsel %vm275_vm1, %v564_v15, %v557_v16 }
 0x329   : > { %v569_v30 = vperm.slane %v565_v24, %v1982_v41 }
 0x32b   : > { %v576_v39 = vshrl.u32 %v569_v30, 16  ;;  %v570_v52 = vrot.slane %v569_v30, 4 }
 0x32c   : > { %v2026_v5 = vpop.trf.xlu1 }
 0x32d   : > { %v948_v28 = vrot.slane %v2026_v5, 4  ;;  %v577_v49 = vpack.i.b16 %v576_v39, %v575_v46  ;;  %v571_v56 = vsel %vm275_vm1, 0, %v570_v52 }
 0x32e   : > { %v582_v63 = vshrl.u32 %v571_v56, 16 }
 0x334   : > { %v1621_v14 = vpop.trf.xlu1 }
 0x33c   : > { %v1622_v22 = vpop.trf.xlu1 }
 0x344   : > { %v1624_v36 = vpop.trf.xlu1 }
 0x345   : > { %v934_v45 = vrot.slane %v1624_v36, 4 }
 0x347   : > { %v935_v53 = vsel %vm275_vm1, %v934_v45, %v1621_v14  ;;  %v574_v45 = vpack.i.b16 %v569_v30, %v549_v31 }
 0x348   : > { %v939_v58 = vperm.slane %v935_v53, %v1964_v23  ;;  %v550_v53 = vrot.slane %v549_v31, 4 }
 0x34a   : > { %v940_v6 = vrot.slane %v939_v58, 4  ;;  %v551_v57 = vsel %vm275_vm1, 0, %v550_v53  ;;  %v363_v58 = vrot.slane %v1638_v54, 4 }
 0x34b   : > { %v580_v0 = vpack.i.b16 %v571_v56, %v551_v57  ;;  %v581_v1 = vshrl.u32 %v551_v57, 16 }
 0x34c   : > { %v1625_v48 = vpop.trf.xlu1 }
 0x34d   : > { %v954_v61 = vrot.slane %v1625_v48, 4 }
 0x34f   : > { %v955_v9 = vsel %vm275_vm1, %v954_v61, %v1622_v22 }
 0x350   : > { %v959_v14 = vperm.slane %v955_v9, %v1964_v23 }
 0x352   : > { %v960_v21 = vrot.slane %v959_v14, 4 }
 0x354   : > { %v1627_v2 = vpop.trf.xlu1 }
 0x355   : > { %v929_v3 = vsel %vm275_vm1, %v928_v60, %v1627_v2  ;;  %v351_v60 = vrot.slane %v1637_v55, 4 }
 0x356   : > { %v933_v7 = vperm.slane %v929_v3, %v1964_v23 }
 0x358   : > { %v941_v11 = vsel %vm275_vm1, %v940_v6, %v933_v7 }
 0x359   : > { %v945_v17 = vperm.slane %v941_v11, %v1982_v41  ;;  %v583_v11 = vpack.i.b16 %v582_v63, %v581_v1 }
 0x35b   : > { %v946_v27 = vrot.slane %v945_v17, 4  ;;  %v971_v13 = vshrl.u32 %v945_v17, 16 }
 0x35c   : > { %v1628_v19 = vpop.trf.xlu1 }
 0x35d   : > { %v949_v20 = vsel %vm275_vm1, %v948_v28, %v1628_v19  ;;  %v947_v34 = vsel %vm275_vm1, 0, %v946_v27 }
 0x35e   : > { %v953_v22 = vperm.slane %v949_v20, %v1964_v23  ;;  %v977_v42 = vshrl.u32 %v947_v34, 16 }
 0x360   : > { %v961_v29 = vsel %vm275_vm1, %v960_v21, %v953_v22 }
 0x361   : > { %v965_v5 = vperm.slane %v961_v29, %v1982_v41 }
 0x363   : > { %v970_v32 = vpack.i.b16 %v965_v5, %v945_v17  ;;  %v972_v33 = vshrl.u32 %v965_v5, 16  ;;  %v966_v35 = vrot.slane %v965_v5, 4 }
 0x365   : > { %v986_v36 = vsel %vm984_vm2, %v970_v32, 0  ;;  %v973_v37 = vpack.i.b16 %v972_v33, %v971_v13  ;;  %v967_v38 = vsel %vm275_vm1, 0, %v966_v35 }
 0x366   : > { %995 = vmatpush.bf16.msra.mxu2 %v986_v36  ;;  %v976_v40 = vpack.i.b16 %v967_v38, %v947_v34  ;;  %v978_v43 = vshrl.u32 %v967_v38, 16 }
 0x367   : > { %v1005_v44 = vsel %vm984_vm2, %v973_v37, 0 }
 0x368   : > { %1014 = vmatpush.bf16.msra.mxu3 %v1005_v44  ;;  %v1024_v47 = vsel %vm984_vm2, %v976_v40, 0  ;;  %v979_v48 = vpack.i.b16 %v978_v43, %v977_v42 }
 0x369   : > { %1499 = vmatmul.msk.bf16.vlgmr.msra.gmra.mxu2 %vm980_vm3, %v574_v45 }
 0x36a   : > { %1033 = vmatpush.bf16.msrb.mxu2 %v1024_v47  ;;  %v1043_v50 = vsel %vm984_vm2, %v979_v48, 0 }
 0x36b   : > { %1500 = vmatmul.msk.bf16.vlgmr.msra.gmra.mxu3 %vm980_vm3, %v577_v49 }
 0x36c   : > { %1052 = vmatpush.bf16.msrb.mxu3 %v1043_v50 }
 0x374   : > { %v1631_v59 = vpop.permute.xlu1 %1630 }
 0x375   : > { %v1633_v61 = vunpack.i.h.bf16 %v1631_v59  ;;  %v1632_v62 = vunpack.i.l.bf16 %v1631_v59 }
 0x377   : > { %v364_v2 = vsel %vm275_vm1, %v363_v58, %v1633_v61  ;;  %v365_v3 = vrot.slane %v1633_v61, 4  ;;  %v352_v6 = vsel %vm275_vm1, %v351_v60, %v1632_v62  ;;  %v353_v7 = vrot.slane %v1632_v62, 4 }
 0x378   : > { %v370_v8 = vperm.slane %v364_v2, %v1964_v23  ;;  %v358_v9 = vperm.slane %v352_v6, %v1964_v23 }
 0x379   : > { %v366_v10 = vsel %vm275_vm1, %v1638_v54, %v365_v3  ;;  %v354_v4 = vsel %vm275_vm1, %v1637_v55, %v353_v7  ;;  %1501 = vmatmul.msk.bf16.vlgmr.msrb.gmra.mxu2 %vm980_vm3, %v580_v0 }
 0x37a   : > { %v374_v12 = vperm.slane %v366_v10, %v1964_v23  ;;  %v375_v14 = vrot.slane %v370_v8, 4  ;;  %v362_v16 = vperm.slane %v354_v4, %v1964_v23  ;;  %v377_v15 = vrot.slane %v358_v9, 4 }
 0x37b   : > { %1502 = vmatmul.msk.bf16.vlgmr.msrb.gmra.mxu3 %vm980_vm3, %v583_v11 }
 0x37c   : > { %v387_v28 = vrot.slane %v374_v12, 4  ;;  %v376_v17 = vsel %vm275_vm1, %v375_v14, %v358_v9  ;;  %v378_v18 = vsel %vm275_vm1, %v370_v8, %v377_v15  ;;  %v389_v26 = vrot.slane %v362_v16, 4 }
 0x37d   : > { %v382_v19 = vperm.slane %v376_v17, %v1982_v41  ;;  %v386_v20 = vperm.slane %v378_v18, %v1982_v41 }
 0x37e   : > { %v388_v21 = vsel %vm275_vm1, %v387_v28, %v362_v16  ;;  %v390_v22 = vsel %vm275_vm1, %v374_v12, %v389_v26 }
 0x37f   : > { %v394_v24 = vperm.slane %v388_v21, %v1982_v41  ;;  %v398_v25 = vperm.slane %v390_v22, %v1982_v41  ;;  %v399_v27 = vrot.slane %v382_v19, 4  ;;  %v401_v29 = vrot.slane %v386_v20, 4 }
 0x380   : > { %v407_v35 = vpack.c.bf16 %v382_v19, %v382_v19  ;;  %v409_v36 = vpack.c.bf16 %v386_v20, %v386_v20 }
 0x381   : > { %v403_v5 = vrot.slane %v394_v24, 4  ;;  %v405_v30 = vrot.slane %v398_v25, 4  ;;  %v400_v13 = vsel %vm275_vm1, 0.0, %v399_v27  ;;  %v402_v31 = vsel %vm275_vm1, 0.0, %v401_v29 }
 0x382   : > { %v411_v32 = vpack.c.bf16 %v394_v24, %v394_v24  ;;  %v413_v33 = vpack.c.bf16 %v398_v25, %v398_v25  ;;  %v408_v43 = vpack.c.bf16 %v400_v13, %v400_v13  ;;  %v410_v44 = vpack.c.bf16 %v402_v31, %v402_v31 }
 0x383   : > { %v406_v34 = vsel %vm275_vm1, 0.0, %v405_v30  ;;  %v404_v37 = vsel %vm275_vm1, 0.0, %v403_v5 }
 0x384   : > { %v1098_v38 = vrot.slane %v411_v32, 4  ;;  %v1104_v39 = vrot.slane %v413_v33, 4  ;;  %v412_v40 = vpack.c.bf16 %v404_v37, %v404_v37  ;;  %v414_v42 = vpack.c.bf16 %v406_v34, %v406_v34 }
 0x386   : > { %v1099_v45 = vsel %vm275_vm1, %v1098_v38, %v407_v35  ;;  %v1105_v46 = vsel %vm275_vm1, %v1104_v39, %v409_v36  ;;  %v1118_v47 = vrot.slane %v412_v40, 4  ;;  %v1124_v48 = vrot.slane %v414_v42, 4 }
 0x387   : > { %v1109_v49 = vperm.slane %v1105_v46, %v1964_v23  ;;  %v1103_v52 = vperm.slane %v1099_v45, %v1964_v23 }
 0x388   : > { %v1119_v50 = vsel %vm275_vm1, %v1118_v47, %v408_v43  ;;  %v1125_v51 = vsel %vm275_vm1, %v1124_v48, %v410_v44 }
 0x389   : > { %v1110_v53 = vrot.slane %v1109_v49, 4  ;;  %v1129_v54 = vperm.slane %v1125_v51, %v1964_v23  ;;  %v1123_v56 = vperm.slane %v1119_v50, %v1964_v23 }
 0x38b   : > { %v1111_v55 = vsel %vm275_vm1, %v1110_v53, %v1103_v52  ;;  %v1130_v57 = vrot.slane %v1129_v54, 4 }
 0x38c   : > { %v1115_v58 = vperm.slane %v1111_v55, %v1982_v41 }
 0x38d   : > { %v1131_v59 = vsel %vm275_vm1, %v1130_v57, %v1123_v56 }
 0x38e   : > { %v1135_v60 = vperm.slane %v1131_v59, %v1982_v41  ;;  %v1116_v61 = vrot.slane %v1115_v58, 4  ;;  %v1141_v62 = vshrl.u32 %v1115_v58, 16 }
 0x390   : > { %v1140_v63 = vpack.i.b16 %v1135_v60, %v1115_v58  ;;  %v1142_v0 = vshrl.u32 %v1135_v60, 16  ;;  %v1117_v1 = vsel %vm275_vm1, 0, %v1116_v61  ;;  %v1136_v2 = vrot.slane %v1135_v60, 4 }
 0x391   : > { %v1147_v9 = vshrl.u32 %v1117_v1, 16 }
 0x392   : > { %v1154_v3 = vsel %vm984_vm2, %v1140_v63, 0  ;;  %v1143_v6 = vpack.i.b16 %v1142_v0, %v1141_v62  ;;  %v1137_v7 = vsel %vm275_vm1, 0, %v1136_v2 }
 0x393   : > { %1163 = vmatpush.bf16.msrb.mxu0 %v1154_v3  ;;  %v1146_v8 = vpack.i.b16 %v1137_v7, %v1117_v1  ;;  %v1148_v10 = vshrl.u32 %v1137_v7, 16 }
 0x394   : > { %v1173_v4 = vsel %vm984_vm2, %v1143_v6, 0 }
 0x395   : > { %1182 = vmatpush.bf16.msrb.mxu1 %v1173_v4  ;;  %v1192_v11 = vsel %vm984_vm2, %v1146_v8, 0  ;;  %v1149_v12 = vpack.i.b16 %v1148_v10, %v1147_v9 }
 0x396   : > { %1201 = vmatpush.bf16.msra.mxu2 %v1192_v11 }
 0x397   : > { %v1211_v14 = vsel %vm984_vm2, %v1149_v12, 0 }
 0x398   : > { %1220 = vmatpush.bf16.msra.mxu3 %v1211_v14 }
 0x3ec   : > { %v997_v16 = vpop.f32.mrf.mxu2 }
 0x3ed   : > { %v1058_v22 = vsel %vm980_vm3, %v997_v16, -inf }
 0x3ee   : > { %v1016_v15 = vpop.f32.mrf.mxu3 }
 0x3ef   : > { %v1061_v25 = vsel %vm980_vm3, %v1016_v15, -inf }
 0x3f4   : > { %v999_v28 = vpop.f32.mrf.mxu2 }
 0x3f6   : > { %v1018_v17 = vpop.f32.mrf.mxu3 }
 0x3fc   : > { %v1035_v18 = vpop.f32.mrf.mxu2 }
 0x3fd   : > { %v1064_v26 = vsel %vm980_vm3, %v1035_v18, -inf }
 0x3fe   : > { %v1054_v19 = vpop.f32.mrf.mxu3  ;;  %1065 = vmax.xlane.f32.xlu2 %v1064_v26 }
 0x3ff   : > { %v1067_v20 = vsel %vm980_vm3, %v1054_v19, -inf }
 0x400   : > { %1068 = vmax.xlane.f32.xlu0 %v1067_v20 }
 0x404   : > { %v1037_v21 = vpop.f32.mrf.mxu2 }
 0x406   : > { %v1056_v24 = vpop.f32.mrf.mxu3  ;;  %1059 = vmax.xlane.f32.xlu2 %v1058_v22 }
 0x40e   : > { %1062 = vmax.xlane.f32.xlu2 %v1061_v25 }
 0x471   : > { %v1066_v27 = vpop.xlane.xlu2 %1065 }
 0x472   : > { %v1072_v29 = vsub.f32 %v1035_v18, %v1066_v27 }
 0x473   : > { %v1069_v5 = vpop.xlane.xlu0 %1068 }
 0x474   : > { %v1078_v30 = vmul.f32 1.442695, %v1072_v29  ;;  %v1073_v13 = vsub.f32 %v1054_v19, %v1069_v5 }
 0x476   : > { %1641 = vpow2.f32 %v1078_v30  ;;  %v1080_v31 = vmul.f32 1.442695, %v1073_v13 }
 0x478   : > { %1643 = vpow2.f32 %v1080_v31 }
 0x479   : > { %v1060_v32 = vpop.xlane.xlu2 %1059 }
 0x47a   : > { %v1070_v33 = vsub.f32 %v997_v16, %v1060_v32 }
 0x47c   : > { %v1642_v34 = vpop.eup %1641  ;;  %v1074_v35 = vmul.f32 1.442695, %v1070_v33 }
 0x47d   : > { %v1096_v36 = vpack.c.bf16 %v1642_v34, %v1642_v34  ;;  %v1088_v37 = vsel %vm980_vm3, %v1642_v34, 0.0 }
 0x47e   : > { %v1644_v38 = vpop.eup %1643  ;;  %1645 = vpow2.f32 %v1074_v35  ;;  %1089 = vadd.xlane.f32.xlu0 %v1088_v37 }
 0x47f   : > { %v1097_v39 = vpack.c.bf16 %v1644_v38, %v1644_v38  ;;  %1505 = vmatmul.msk.bf16.vlgmr.msra.gmra.mxu2 %vm980_vm3, %v1096_v36  ;;  %v1091_v40 = vsel %vm980_vm3, %v1644_v38, 0.0 }
 0x480   : > { %1092 = vadd.xlane.f32.xlu2 %v1091_v40 }
 0x481   : > { %1506 = vmatmul.msk.bf16.vlgmr.msra.gmra.mxu3 %vm980_vm3, %v1097_v39  ;;  %v1063_v42 = vpop.xlane.xlu2 %1062 }
 0x482   : > { %v1071_v43 = vsub.f32 %v1016_v15, %v1063_v42 }
 0x484   : > { %v1646_v44 = vpop.eup %1645  ;;  %v1076_v45 = vmul.f32 1.442695, %v1071_v43 }
 0x485   : > { %v1082_v46 = vsel %vm980_vm3, %v1646_v44, 0.0  ;;  %v1094_v47 = vpack.c.bf16 %v1646_v44, %v1646_v44 }
 0x486   : > { %1647 = vpow2.f32 %v1076_v45  ;;  %1083 = vadd.xlane.f32.xlu1 %v1082_v46 }
 0x487   : > { %1503 = vmatmul.msk.bf16.vlgmr.msrb.gmra.mxu0 %vm980_vm3, %v1094_v47 }
 0x48c   : > { %v1648_v48 = vpop.eup %1647 }
 0x48d   : > { %v1085_v49 = vsel %vm980_vm3, %v1648_v48, 0.0  ;;  %v1095_v50 = vpack.c.bf16 %v1648_v48, %v1648_v48 }
 0x48e   : > { %1086 = vadd.xlane.f32.xlu0 %v1085_v49 }
 0x48f   : > { %1504 = vmatmul.msk.bf16.vlgmr.msrb.gmra.mxu1 %vm980_vm3, %v1095_v50 }
 0x4f1   : > { %v1090_v51 = vpop.xlane.xlu0 %1089 }
 0x4f2   : > { %1649 = vrcp.f32 %v1090_v51 }
 0x4f3   : > { %v1093_v53 = vpop.xlane.xlu2 %1092 }
 0x4f8   : > { %v1650_v54 = vpop.eup %1649 }
 0x4f9   : > { %v1084_v52 = vpop.xlane.xlu1 %1083 }
 0x4fa   : > { %1651 = vrcp.f32 %v1084_v52 }
 0x4fb   : > { %1653 = vrcp.f32 %v1093_v53 }
 0x500   : > { %v1652_v58 = vpop.eup %1651 }
 0x501   : > { %v1087_v56 = vpop.xlane.xlu0 %1086  ;;  %v1654_v0 = vpop.eup %1653 }
 0x502   : > { %v1203_v55 = vpop.f32.mrf.mxu2  ;;  %1655 = vrcp.f32 %v1087_v56 }
 0x503   : > { %v1232_v57 = vmul.f32 %v1650_v54, %v1203_v55 }
 0x504   : > { %v1165_v59 = vpop.f32.mrf.mxu0  ;;  %v1222_v60 = vpop.f32.mrf.mxu3 }
 0x505   : > { %v1234_v61 = vrot.slane %v1232_v57, 4  ;;  %v1230_v62 = vmul.f32 %v1652_v58, %v1165_v59  ;;  %v1233_v2 = vmul.f32 %v1654_v0, %v1222_v60 }
 0x507   : > { %v1236_v63 = vrot.slane %v1230_v62, 4  ;;  %v1235_v1 = vsel %vm275_vm1, %v1234_v61, %v1230_v62  ;;  %v1246_v4 = vrot.slane %v1233_v2, 4 }
 0x508   : > { %v1656_v7 = vpop.eup %1655  ;;  %v1241_v8 = vperm.slane %v1235_v1, %v1964_v23 }
 0x509   : > { %v1237_v6 = vsel %vm275_vm1, %v1232_v57, %v1236_v63 }
 0x50a   : > { %v1205_v3 = vpop.f32.mrf.mxu2  ;;  %v1245_v14 = vperm.slane %v1237_v6, %v1964_v23  ;;  %v1260_v28 = vrot.slane %v1241_v8, 4 }
 0x50c   : > { %v1167_v9 = vpop.f32.mrf.mxu0  ;;  %v1184_v10 = vpop.f32.mrf.mxu1  ;;  %v1272_v26 = vrot.slane %v1245_v14, 4 }
 0x50d   : > { %v1231_v11 = vmul.f32 %v1656_v7, %v1184_v10  ;;  %v1224_v12 = vpop.f32.mrf.mxu3 }
 0x50f   : > { %v1247_v16 = vsel %vm275_vm1, %v1246_v4, %v1231_v11  ;;  %v1248_v15 = vrot.slane %v1231_v11, 4 }
 0x510   : > { %v1253_v17 = vperm.slane %v1247_v16, %v1964_v23 }
 0x511   : > { %v1249_v18 = vsel %vm275_vm1, %v1233_v2, %v1248_v15 }
 0x512   : > { %v1257_v19 = vperm.slane %v1249_v18, %v1964_v23  ;;  %v1258_v20 = vrot.slane %v1253_v17, 4  ;;  %v1261_v21 = vsel %vm275_vm1, %v1253_v17, %v1260_v28 }
 0x513   : > { %v1269_v22 = vperm.slane %v1261_v21, %v1982_v41 }
 0x514   : > { %v1259_v24 = vsel %vm275_vm1, %v1258_v20, %v1241_v8  ;;  %v1270_v25 = vrot.slane %v1257_v19, 4  ;;  %v1273_v27 = vsel %vm275_vm1, %v1257_v19, %v1272_v26  ;;  %v1186_v29 = vpop.f32.mrf.mxu1 }
 0x515   : > { %v1265_v5 = vperm.slane %v1259_v24, %v1982_v41  ;;  %v1281_v30 = vperm.slane %v1273_v27, %v1982_v41  ;;  %v1284_v13 = vrot.slane %v1269_v22, 4 }
 0x516   : > { %v1271_v31 = vsel %vm275_vm1, %v1270_v25, %v1245_v14 }
 0x517   : > { %v1277_v32 = vperm.slane %v1271_v31, %v1982_v41  ;;  %v1282_v33 = vrot.slane %v1265_v5, 4  ;;  %v1285_v34 = vsel %vm275_vm1, 0.0, %v1284_v13  ;;  %v1288_v35 = vrot.slane %v1281_v30, 4 }
 0x518   : > { %v1295_v36 = vrot.slane %v1285_v34, 4  ;;  %v1290_v37 = vsel %vm275_vm1, %v1284_v13, %v1265_v5 }
 0x519   : > { %v1286_v38 = vrot.slane %v1277_v32, 4  ;;  %v1289_v39 = vsel %vm275_vm1, 0.0, %v1288_v35  ;;  %v1283_v40 = vsel %vm275_vm1, 0.0, %v1282_v33  ;;  %v1294_v42 = vperm.slane %v1290_v37, %v1964_v23 }
 0x51a   : > { %v1306_v43 = vrot.slane %v1289_v39, 4  ;;  %v1296_v44 = vsel %vm275_vm1, %v1295_v36, %v1283_v40  ;;  %v1301_v45 = vsel %vm275_vm1, %v1288_v35, %v1277_v32 }
 0x51b   : > { %v1287_v46 = vsel %vm275_vm1, 0.0, %v1286_v38  ;;  %v1300_v47 = vperm.slane %v1296_v44, %v1964_v23  ;;  %v1305_v48 = vperm.slane %v1301_v45, %v1964_v23  ;;  %v1314_v49 = vrot.slane %v1294_v42, 4 }
 0x51c   : > { %v1307_v50 = vsel %vm275_vm1, %v1306_v43, %v1287_v46 }
 0x51d   : > { %v1311_v51 = vperm.slane %v1307_v50, %v1964_v23  ;;  %v1326_v52 = vrot.slane %v1305_v48, 4  ;;  %v1312_v53 = vrot.slane %v1300_v47, 4  ;;  %v1315_v54 = vsel %vm275_vm1, %v1300_v47, %v1314_v49 }
 0x51e   : > { %v1323_v61 = vperm.slane %v1315_v54, %v1982_v41 }
 0x51f   : > { %v1327_v55 = vsel %vm275_vm1, %v1311_v51, %v1326_v52  ;;  %v1313_v56 = vsel %vm275_vm1, %v1312_v53, %v1294_v42  ;;  %v1324_v57 = vrot.slane %v1311_v51, 4 }
 0x520   : > { %v1335_v58 = vperm.slane %v1327_v55, %v1982_v41  ;;  %v1319_v59 = vperm.slane %v1313_v56, %v1982_v41  ;;  %v1342_v6 = vrot.slane %v1323_v61, 4 }
 0x521   : > { %v1325_v60 = vsel %vm275_vm1, %v1324_v57, %v1305_v48 }
 0x522   : > { %v1340_v62 = vrot.slane %v1335_v58, 4  ;;  %v1331_v23 = vperm.slane %v1325_v60, %v1982_v41  ;;  %v1338_v63 = vrot.slane %v1319_v59, 4  ;;  %v1343_v7 = vsel %vm275_vm1, %v1335_v58, %v1342_v6 }
 0x524   : > { %v1341_v0 = vsel %vm275_vm1, %v1340_v62, %v1323_v61  ;;  %v1336_v1 = vrot.slane %v1331_v23, 4  ;;  %v1339_v2 = vsel %vm275_vm1, %v1331_v23, %v1338_v63 }
 0x525   : > { %1349 = vrot.lane.b32.xlu0 %v1341_v0, %s1814_s18  ;;  %1345 = vrot.lane.b32.xlu2 %v1339_v2, %s1815_s24 }
 0x526   : > { %v1337_v3 = vsel %vm275_vm1, %v1336_v1, %v1319_v59 }
 0x52d   : > { %1353 = vrot.lane.b32.xlu0 %v1343_v7, %s1816_s25 }
 0x57f   : > { %v1346_v8 = vpop.permute.xlu2 %1345 }
 0x580   : > { %v1356_v9 = vsel %vm980_vm3, %v1337_v3, %v1346_v8 }
 0x597   : > { %v1350_v41 = vpop.permute.xlu0 %1349 }
 0x598   : > { %v1358_v10 = vsel %vm1357_vm4, %v1356_v9, %v1350_v41 }
 0x59f   : > { %v1354_v4 = vpop.permute.xlu0 %1353 }
 0x5a0   : > { %v1360_v11 = vsel %vm1359_vm5, %v1358_v10, %v1354_v4 }
 0x5a1   : > { %1361 = vst.msk [vmem:[%s218_s23] sm:$0xff] %vm247_vm0, %v1360_v11 }
 0x5a2   : > { %1744 = shalt.err (!%p1741_p13)
}
 0x5a3   : > { %1521 = dma.vmem_to_hbm [thread:$0]  (%p1908_p4), %s1377_s4, 128, %s1379_s5, %s1363_s15  }
 0x5a4 PF: > { %s1390_s28 = sand.u32 1, %s1783_s12   ;;  %p1532_p0 = pnand %p1474_p6, %p1916_p7 }
 0x5a5   : > { %s1391_s25 = scalar_lea.sflag [#allocation4], %s1390_s28 }
 0x5a6   : > { %p1533_p2 = pneg %p1532_p0 }
 0x5a8   : > { %1778 = dma.done.wait (%p1533_p2), %s1391_s25, 128  }
 0x5a9   : > { %1780 = vsyncadd (%p1533_p2), %s1391_s25, 4294967168  ;;  %s20_s17 = sadd.s32 1, %s1803_s17   ;;  %s2230_s12 = smov %s1787_s13 }
 0x5aa   : > { %p17_p5 = scmp.ge.s32.totalorder %s20_s17, 4   ;;  %s2231_s13 = smov %s1791_s14 }
 0x5ab   : > { %s2232_s14 = smov %s1914_s8  ;;  %s2233_s15 = smov %s1799_s16 }
 0x5ac   : > { %s2234_s16 = smov %s2236_s29  ;;  %19 = sbr.rel (!%p17_p5) target bundleno = 7 (0x7), region = 82 }
 0x5b1   :  { %1397 = vsyncpa [#allocation3], 1 }
 0x5b2   :  { %1399 = vsyncpa [#allocation3 + $0x1], 1 }
 0x5b3   :  { %1400 = vsyncpa [#allocation6], 1 }
 0x5b4   :  { %1401 = vsyncpa [#allocation4], 1 }
 0x5b5   :  { %1403 = vsyncpa [#allocation4 + $0x1], 1 }

// kernel: tpu_custom_call.1
= control target key start
LH: loop header
LB: loop body
LE: loop exit
PB: predicated region body
PF: predicated region fallthrough
CT: control target
= control target key end

     0   :  { %8 = vsyncpa [#allocation3], 0  ;;  %s2220_s0 = inlined_call_operand.hbm [shape: bf16[2,8,32], index: 0, kind: input, shape index: {}]   ;;  %s2221_s1 = inlined_call_operand.hbm [shape: bf16[32,96], index: 1, kind: input, shape index: {}]   ;;  %s2222_s2 = inlined_call_operand.vmem [shape: f32[1,96], index: 2, kind: input, shape index: {}]   ;;  %s2223_s3 = inlined_call_operand.hbm [shape: f32[2,8,32], index: 3, kind: output, shape index: {}]  }
   0x1   :  { %10 = vsyncpa [#allocation3 + $0x1], 0 }
   0x2   :  { %11 = vsyncpa [#allocation6], 0 }
   0x3   :  { %12 = vsyncpa [#allocation4], 0 }
   0x4   :  { %14 = vsyncpa [#allocation4 + $0x1], 0  ;;  %s1837_s12 = smov 0   ;;  %s1839_s13 = smov 0  }
   0x5   :  { %s1841_s14 = smov 0   ;;  %s1843_s15 = smov 0  }
   0x6   :  { %s1845_s16 = smov 0   ;;  %s1847_s17 = smov 0  }
   0x7 LB: > { %s1470_s18 = sadd.s32 4294967295, %s1803_s17   ;;  %p1472_p0 = scmp.ge.s32.totalorder %s1803_s17, 1  ;;  %s1803_s17 = sphi %s1847_s17, %s20_s17   ;;  %s1799_s16 = sphi %s1845_s16, %s2234_s16   ;;  %s1795_s15 = sphi %s1843_s15, %s2233_s15   ;;  %s1791_s14 = sphi %s1841_s14, %s2232_s14   ;;  %s1787_s13 = sphi %s1839_s13, %s2231_s13   ;;  %s1783_s12 = sphi %s1837_s12, %s2230_s12  }
   0x8   : > { %p1869_p1 = scmp.eq.s32.totalorder %s1470_s18, 0  ;;  %p133_p2 = scmp.lt.s32.totalorder %s1803_s17, 3 }
   0x9   : > { %s144_s22 = sshll.u32 %s2221_s1, 4  ;;  %s1805_s24 = smov [#allocation5]   ;;  %s145_s22 = int_to_ptr.hbm [resolvable:$true] %s144_s22 }
   0xa   : > { %p1877_p3 = pnand %p1472_p0, %p133_p2  ;;  %s146_s25 = sshll.u32 %s1805_s24, 4  ;;  %s147_s25 = int_to_ptr.vmem [resolvable:$true] %s146_s25 }
   0xb   : > { %p1474_p6 = scmp.ge.s32.totalorder %s1803_s17, 2  ;;  %s1806_s26 = smov 64  }
   0xc   : > { %p1523_p4 = pneg %p1877_p3  ;;  %s1807_s27 = smov 4  }
   0xd   : > { %s1471_s28 = sadd.s32 4294967294, %s1803_s17   ;;  %s32_s29 = sadd.s32 1, %s1799_s16 }
   0xe   : > { %p1524_p5 = pnand %p1523_p4, %p1869_p1  ;;  %s39_s30 = sadd.s32 1, %s1791_s14 }
   0xf   : > { %p34_p7 = scmp.ge.s32.totalorder %s32_s29, 2  ;;  %p46_p8 = scmp.ne.s32.totalorder %s1791_s14, %s1787_s13 }
  0x10   : > { %1526 = dma.hbm_to_vmem [thread:$0]  (!%p1524_p5), %s145_s22, 256, %s147_s25, [#allocation6], %s1806_s26, %s1806_s26, %s1807_s27  }
  0x11   : > { %p47_p9 = scmp.eq.s32.totalorder %s1803_s17, 0  ;;  %p52_p10 = scmp.ne.s32.totalorder %s1787_s13, %s1783_s12 }
  0x12   : > { %s2236_s29 = smov (%p34_p7, %s32_s29), 0  ;;  %p120_p13 = scmp.eq.s32.totalorder %s1470_s18, 1 }
  0x13   : > { %p1896_p11 = por %p47_p9, %p46_p8  ;;  %p1902_p12 = por %p1869_p1, %p52_p10 }
  0x14   : > { %s36_s6 = ssub.s32 %s1799_s16, %s2236_s29  ;;  %p126_p2 = scmp.eq.s32.totalorder %s1471_s28, 1 }
  0x15   : > { %p37_p0 = scmp.eq.s32.totalorder %s36_s6, 0  ;;  %p1908_p4 = por %p120_p13, %p46_p8 }
  0x16   : > { %p1536_p5 = scmp.lt.s32.totalorder %s1803_s17, 2  ;;  %p1916_p7 = por %p126_p2, %p52_p10 }
  0x17   : > { %s1914_s8 = scalar_select %p37_p0, %s1791_s14, %s39_s30  }
  0x18   : > { %s163_s10 = sand.u32 1, %s1791_s14   ;;  %s1476_s20 = sshll.u32 %s1799_s16, 2 }
  0x19   : > { %s1475_s11 = sshll.u32 %s163_s10, 2  ;;  %s171_s18 = scalar_lea.hbm %s2220_s0, %s1476_s20 }
  0x1a   : > { %s167_s24 = scalar_lea.vmem [#allocation2], %s1475_s11  ;;  %s173_s26 = sshll.u32 %s171_s18, 4  ;;  %s174_s26 = int_to_ptr.hbm [resolvable:$true] %s173_s26 }
  0x1b   : > { %s175_s25 = sshll.u32 %s167_s24, 4  ;;  %p1528_p8 = pnand %p1536_p5, %p1896_p11  ;;  %s176_s25 = int_to_ptr.vmem [resolvable:$true] %s175_s25 }
  0x1c   : > { %s164_s27 = scalar_lea.sflag [#allocation3], %s163_s10  ;;  %184 = sbr.rel (%p1877_p3) target bundleno = 1444 (0x5a4), region = 32 }
  0x1d   : > { %1530 = dma.hbm_to_vmem [thread:$0]  (!%p1528_p8), %s174_s26, 64, %s176_s25, %s164_s27  }
  0x1e   : > { %s1930_s28 = sand.u32 (!%p1877_p3), 1, %s1787_s13  }
  0x1f   : > { %s1478_s30 = sshll.u32 (!%p1877_p3), %s1930_s28, 2  ;;  %s187_s6 = scalar_lea.sflag (!%p1877_p3), [#allocation3], %s1930_s28 }
  0x20   : > { %s190_s11 = scalar_lea.vmem (!%p1877_p3), [#allocation2], %s1478_s30 }
  0x21   : > { %1770 = dma.done.wait (%p1902_p12), %s187_s6, 64  }
  0x22   : > { %1772 = vsyncadd (%p1902_p12), %s187_s6, 4294967232 }
  0x23   : > { %1774 = dma.done.wait (%p1869_p1), [#allocation6], 256  }
  0x24   : > { %1776 = vsyncadd (%p1869_p1), [#allocation6], 4294967040  ;;  %v1512_v0 = vld [vmem:[#allocation5 + $0x8] sm:$0xff]  ;;  %s1808_s23 = smov 96   ;;  %v1511_v2 = vld [vmem:[#allocation5] sm:$0xff]  ;;  %vm247_vm0 = vcmask 261120  }
  0x25   : > { %v1514_v1 = vld [vmem:[#allocation5 + $0x8] sm:$0xff]  ;;  %240 = vrot.lane.b32.xlu0 %v1512_v0, %s1808_s23  ;;  %v1513_v3 = vld [vmem:[#allocation5] sm:$0xff]  ;;  %v420_v4 = vld [vmem:[%s190_s11] sm:$0xf]  ;;  %s1809_s20 = smov 104   ;;  %s1810_s21 = smov 120  }
  0x26   : > { %450 = vmatpush.bf16.msra.mxu1 %v1514_v1  ;;  %v1639_v5 = vld [vmem:[%s2222_s2] ss:$0 sm:$0xff]  ;;  %s1811_s22 = smov 112   ;;  %v1812_v19 = vmov 1983009808   ;;  %vm275_vm1 = vcmask 1047556  }
  0x27   : > { %244 = vrot.lane.b32.xlu1 %v1639_v5, %s1808_s23  ;;  %v220_v8 = vld [vmem:[%s190_s11] sm:$0xf]  ;;  %v280_v20 = vunpack.c.l.s4 %v1812_v19  ;;  %v1813_v33 = vmov 1934713408   ;;  %vm984_vm2 = vcmask 1043456   ;;  %vm980_vm3 = vcmask 64512  }
  0x28   : > { %v1640_v11 = vld [vmem:[%s2222_s2] ss:$0 sm:$0xff]  ;;  %v304_v34 = vunpack.c.l.s4 %v1813_v33  ;;  %s1814_s18 = smov 16   ;;  %s1815_s24 = smov 8   ;;  %vm1357_vm4 = vcmask 130048   ;;  %vm1359_vm5 = vcmask 195584  }
  0x29   : > { %v1964_v23 = vunpack.c.0.s8 %v280_v20  ;;  %s1816_s25 = smov 24   ;;  %s1480_s26 = sshll.u32 %s1930_s28, 3 }
  0x2a   : > { %451 = vmatpush.bf16.msra.mxu1 %v1513_v3  ;;  %v1982_v41 = vunpack.c.0.s8 %v304_v34  ;;  %s1508_s27 = sshll.u32 %s1795_s15, 3  ;;  %s1363_s15 = scalar_lea.sflag [#allocation4], %s1930_s28 }
  0x2b   : > { %s1374_s11 = scalar_lea.hbm %s2223_s3, %s1508_s27 }
  0x2c   : > { %s1378_s5 = sshll.u32 %s1374_s11, 4  ;;  %s1379_s5 = int_to_ptr.hbm [resolvable:$true] %s1378_s5 }
  0x2d   : > { %238 = vrot.lane.b32.xlu0 %v1511_v2, %s1808_s23  ;;  %1498 = vmatmul.msk.bf16.vlgmr.msra.gmra.mxu1 %vm247_vm0, %v420_v4  ;;  %s1731_s19 = sshra.s32 %s1379_s5, 4  ;;  %s1732_s19 = int_to_ptr.hbm [resolvable:$true] %s1731_s19 }
  0x2e   : > { %s1733_s10 = scalar_lea.hbm %s1732_s19, 8  ;;  %p1738_p10 = scmp.lt.s32.totalorder %s1732_s19, %s2223_s3 }
  0x2f   : > { %p1734_p1 = scmp.ne.s32.totalorder %s1732_s19, %s1733_s10 }
  0x31   : > { %p1735_p3 = pnand %p1734_p1, %p1908_p4 }
  0x33   : > { %p1736_p9 = pneg %p1735_p3 }
  0x97   : > { %v241_v6 = vpop.permute.xlu0 %240 }
  0x98   : > { %257 = vmatpush.bf16.msra.mxu0 %v241_v6 }
  0x99   : > { %v245_v12 = vpop.permute.xlu1 %244 }
  0x9f   : > { %v239_v7 = vpop.permute.xlu0 %238 }
  0xa0   : > { %258 = vmatpush.bf16.msra.mxu0 %v239_v7 }
  0xa3   : > { %1489 = vmatmul.msk.bf16.vlgmr.msra.gmra.mxu0 %vm247_vm0, %v220_v8 }
  0xaa   : > { %v453_v9 = vpop.f32.mrf.mxu1 }
  0xab   : > { %v1953_v13 = vadd.f32 %v1640_v11, %v453_v9 }
  0xb2   : > { %v455_v10 = vpop.f32.mrf.mxu1 }
 0x120   : > { %v260_v14 = vpop.f32.mrf.mxu0 }
 0x121   : > { %v1955_v15 = vadd.f32 %v260_v14, %v245_v12 }
 0x123   : > { %271 = vrot.lane.b32.xlu2 %v1955_v15, %s1809_s20  ;;  %v1600_v16 = vpack.i.bf16 %v1953_v13, %v1955_v15  ;;  %v277_v22 = vrot.slane %v1955_v15, 4 }
 0x125   : > { %1601 = vrot.lane.b32.xlu1 %v1600_v16, %s1810_s21 }
 0x128   : > { %v262_v17 = vpop.f32.mrf.mxu0 }
 0x12b   : > { %268 = vrot.lane.b32.xlu2 %v1955_v15, %s1811_s22 }
 0x17d   : > { %v272_v18 = vpop.permute.xlu2 %271 }
 0x17e   : > { %v287_v27 = vrot.slane %v272_v18, 4 }
 0x185   : > { %v269_v21 = vpop.permute.xlu2 %268 }
 0x186   : > { %v274_v24 = vrot.slane %v269_v21, 4  ;;  %v278_v25 = vsel %vm275_vm1, %v269_v21, %v277_v22  ;;  %v1634_v4 = vpack.i.bf16 %v272_v18, %v269_v21 }
 0x187   : > { %v286_v29 = vperm.slane %v278_v25, %v1964_v23 }
 0x188   : > { %v276_v30 = vsel %vm275_vm1, %v274_v24, %v1955_v15 }
 0x189   : > { %v282_v37 = vperm.slane %v276_v30, %v1964_v23  ;;  %v313_v38 = vrot.slane %v286_v29, 4 }
 0x18b   : > { %v301_v59 = vrot.slane %v282_v37, 4 }
 0x197   : > { %v1967_v26 = vpop.permute.xlu1 %1601 }
 0x198   : > { %v1970_v28 = vunpack.i.l.bf16 %v1967_v26 }
 0x19a   : > { %v288_v31 = vsel %vm275_vm1, %v287_v27, %v1970_v28  ;;  %v289_v32 = vrot.slane %v1970_v28, 4 }
 0x19b   : > { %v294_v35 = vperm.slane %v288_v31, %v1964_v23 }
 0x19c   : > { %v290_v36 = vsel %vm275_vm1, %v272_v18, %v289_v32 }
 0x19d   : > { %v299_v39 = vrot.slane %v294_v35, 4  ;;  %v298_v40 = vperm.slane %v290_v36, %v1964_v23  ;;  %v302_v62 = vsel %vm275_vm1, %v294_v35, %v301_v59 }
 0x19e   : > { %v310_v63 = vperm.slane %v302_v62, %v1982_v41 }
 0x19f   : > { %v300_v42 = vsel %vm275_vm1, %v299_v39, %v282_v37  ;;  %v314_v43 = vsel %vm275_vm1, %v298_v40, %v313_v38  ;;  %v311_v44 = vrot.slane %v298_v40, 4 }
 0x1a0   : > { %v306_v45 = vperm.slane %v300_v42, %v1982_v41  ;;  %v322_v46 = vperm.slane %v314_v43, %v1982_v41  ;;  %v325_v0 = vrot.slane %v310_v63, 4  ;;  %v333_v2 = vpack.c.bf16 %v310_v63, %v310_v63 }
 0x1a1   : > { %v312_v47 = vsel %vm275_vm1, %v311_v44, %v286_v29 }
 0x1a2   : > { %v323_v48 = vrot.slane %v306_v45, 4  ;;  %v329_v49 = vrot.slane %v322_v46, 4  ;;  %v318_v50 = vperm.slane %v312_v47, %v1982_v41  ;;  %v331_v53 = vpack.c.bf16 %v306_v45, %v306_v45 }
 0x1a3   : > { %v337_v57 = vpack.c.bf16 %v322_v46, %v322_v46  ;;  %v326_v1 = vsel %vm275_vm1, 0.0, %v325_v0 }
 0x1a4   : > { %v324_v51 = vsel %vm275_vm1, 0.0, %v323_v48  ;;  %v330_v52 = vsel %vm275_vm1, 0.0, %v329_v49  ;;  %v327_v56 = vrot.slane %v318_v50, 4  ;;  %v335_v60 = vpack.c.bf16 %v318_v50, %v318_v50 }
 0x1a5   : > { %v332_v54 = vpack.c.bf16 %v324_v51, %v324_v51  ;;  %v338_v55 = vpack.c.bf16 %v330_v52, %v330_v52  ;;  %v334_v3 = vpack.c.bf16 %v326_v1, %v326_v1 }
 0x1a6   : > { %v328_v58 = vsel %vm275_vm1, 0.0, %v327_v56 }
 0x1a7   : > { %1611 = vxpose.binary.xlu1.c.b16.start.end [1/2] (short) (narrow) %v332_v54, %v331_v53, 16  ;;  %v336_v61 = vpack.c.bf16 %v328_v58, %v328_v58 }
 0x1a8   : > { %1605 = vxpose.binary.xlu2.c.b16.start.end [1/2] (short) (narrow) %v338_v55, %v337_v57, 16 }
 0x1a9   : > { %1608 = vxpose.binary.xlu0.c.b16.start.end [1/2] (short) (narrow) %v336_v61, %v335_v60, 16 }
 0x1b9   : > { %1614 = vxpose.binary.xlu0.c.b16.start.end [1/2] (short) (narrow) %v334_v3, %v333_v2, 16  ;;  %v1629_v3 = vpack.i.bf16 %v1970_v28, %v1955_v15 }
 0x211   : > { %461 = vrot.lane.b32.xlu2 %v1953_v13, %s1811_s22  ;;  %s1737_s22 = scalar_lea.hbm %s2223_s3, 16 }
 0x212   : > { %p1739_p11 = scmp.lt.s32.totalorder %s1737_s22, %s1733_s10 }
 0x214   : > { %p1740_p12 = por %p1739_p11, %p1738_p10 }
 0x216   : > { %p1741_p13 = pnand %p1740_p12, %p1736_p9 }
 0x219   : > { %1635 = vrot.lane.b32.xlu2 %v1634_v4, %s1808_s23 }
 0x227   : > { %464 = vrot.lane.b32.xlu0 %v1953_v13, %s1809_s20 }
 0x249   : > { %v1606_v8 = vpop.trf.xlu2 }
 0x24a   : > { %v718_v10 = vrot.slane %v1606_v8, 4  ;;  %v469_v8 = vrot.slane %v1953_v13, 4 }
 0x251   : > { %v1607_v20 = vpop.trf.xlu2 }
 0x252   : > { %v746_v22 = vrot.slane %v1607_v20, 4 }
 0x253   : > { %v1612_v6 = vpop.trf.xlu1 }
 0x255   : > { %v1609_v5 = vpop.trf.xlu0 }
 0x256   : > { %v712_v9 = vrot.slane %v1609_v5, 4 }
 0x258   : > { %v713_v11 = vsel %vm275_vm1, %v712_v9, %v1612_v6  ;;  %v1604_v6 = vunpack.i.h.bf16 %v1967_v26 }
 0x259   : > { %v717_v18 = vperm.slane %v713_v11, %v1964_v23 }
 0x25a   : > { %v481_v11 = vrot.slane %v1604_v6, 4 }
 0x25b   : > { %v1613_v14 = vpop.trf.xlu1  ;;  %v726_v24 = vrot.slane %v717_v18, 4 }
 0x25d   : > { %v1610_v7 = vpop.trf.xlu0 }
 0x25e   : > { %v740_v12 = vrot.slane %v1610_v7, 4 }
 0x260   : > { %v741_v19 = vsel %vm275_vm1, %v740_v12, %v1613_v14 }
 0x261   : > { %v745_v25 = vperm.slane %v741_v19, %v1964_v23 }
 0x263   : > { %v754_v31 = vrot.slane %v745_v25, 4 }
 0x265   : > { %v1615_v16 = vpop.trf.xlu0 }
 0x266   : > { %v719_v17 = vsel %vm275_vm1, %v718_v10, %v1615_v16 }
 0x267   : > { %v723_v21 = vperm.slane %v719_v17, %v1964_v23 }
 0x269   : > { %v727_v27 = vsel %vm275_vm1, %v723_v21, %v726_v24  ;;  %v724_v36 = vrot.slane %v723_v21, 4 }
 0x26a   : > { %v735_v33 = vperm.slane %v727_v27, %v1982_v41 }
 0x26b   : > { %v725_v42 = vsel %vm275_vm1, %v724_v36, %v717_v18  ;;  %v462_v7 = vpop.permute.xlu2 %461 }
 0x26c   : > { %v788_v39 = vshrl.u32 %v735_v33, 16  ;;  %v731_v46 = vperm.slane %v725_v42, %v1982_v41  ;;  %v738_v56 = vrot.slane %v735_v33, 4  ;;  %v467_v10 = vrot.slane %v462_v7, 4 }
 0x26d   : > { %v1616_v29 = vpop.trf.xlu0  ;;  %v470_v12 = vsel %vm275_vm1, %v462_v7, %v469_v8 }
 0x26e   : > { %v747_v30 = vsel %vm275_vm1, %v746_v22, %v1616_v29  ;;  %v736_v48 = vrot.slane %v731_v46, 4  ;;  %v739_v58 = vsel %vm275_vm1, 0, %v738_v56  ;;  %v772_v0 = vshrl.u32 %v731_v46, 16 }
 0x26f   : > { %v751_v32 = vperm.slane %v747_v30, %v1964_v23  ;;  %v796_v60 = vshrl.u32 %v739_v58, 16  ;;  %v468_v28 = vsel %vm275_vm1, %v467_v10, %v1953_v13  ;;  %v478_v17 = vperm.slane %v470_v12, %v1964_v23 }
 0x270   : > { %v737_v50 = vsel %vm275_vm1, 0, %v736_v48  ;;  %v474_v19 = vperm.slane %v468_v28, %v1964_v23 }
 0x271   : > { %v752_v34 = vrot.slane %v751_v32, 4  ;;  %v755_v35 = vsel %vm275_vm1, %v751_v32, %v754_v31  ;;  %v780_v52 = vshrl.u32 %v737_v50, 16  ;;  %v505_v20 = vrot.slane %v478_v17, 4 }
 0x272   : > { %v763_v37 = vperm.slane %v755_v35, %v1982_v41  ;;  %v493_v27 = vrot.slane %v474_v19, 4 }
 0x273   : > { %v753_v38 = vsel %vm275_vm1, %v752_v34, %v745_v25 }
 0x274   : > { %v789_v40 = vshrl.u32 %v763_v37, 16  ;;  %v786_v43 = vpack.i.b16 %v763_v37, %v735_v33  ;;  %v759_v45 = vperm.slane %v753_v38, %v1982_v41  ;;  %v766_v55 = vrot.slane %v763_v37, 4 }
 0x276   : > { %v790_v44 = vpack.i.b16 %v789_v40, %v788_v39  ;;  %v764_v47 = vrot.slane %v759_v45, 4  ;;  %v767_v57 = vsel %vm275_vm1, 0, %v766_v55  ;;  %v773_v63 = vshrl.u32 %v759_v45, 16 }
 0x277   : > { %v797_v59 = vshrl.u32 %v767_v57, 16  ;;  %v794_v61 = vpack.i.b16 %v767_v57, %v739_v58  ;;  %v770_v1 = vpack.i.b16 %v759_v45, %v731_v46 }
 0x278   : > { %1617 = vxpose.binary.xlu1.c.b16.start.end [1/2] (short) (narrow) %v790_v44, %v786_v43, 16  ;;  %v765_v49 = vsel %vm275_vm1, 0, %v764_v47  ;;  %v774_v2 = vpack.i.b16 %v773_v63, %v772_v0 }
 0x279   : > { %v781_v51 = vshrl.u32 %v765_v49, 16  ;;  %v778_v53 = vpack.i.b16 %v765_v49, %v737_v50  ;;  %v798_v62 = vpack.i.b16 %v797_v59, %v796_v60 }
 0x27b   : > { %v782_v54 = vpack.i.b16 %v781_v51, %v780_v52 }
 0x288   : > { %1620 = vxpose.binary.xlu1.c.b16.start.end [1/2] (short) (narrow) %v782_v54, %v778_v53, 16 }
 0x298   : > { %1623 = vxpose.binary.xlu1.c.b16.start.end [1/2] (short) (narrow) %v798_v62, %v794_v61, 16 }
 0x299   : > { %v465_v9 = vpop.permute.xlu0 %464 }
 0x29a   : > { %v479_v16 = vrot.slane %v465_v9, 4  ;;  %v482_v15 = vsel %vm275_vm1, %v465_v9, %v481_v11 }
 0x29b   : > { %v490_v26 = vperm.slane %v482_v15, %v1964_v23 }
 0x29c   : > { %v480_v18 = vsel %vm275_vm1, %v479_v16, %v1604_v6 }
 0x29d   : > { %v486_v21 = vperm.slane %v480_v18, %v1964_v23  ;;  %v503_v24 = vrot.slane %v490_v26, 4  ;;  %v506_v25 = vsel %vm275_vm1, %v490_v26, %v505_v20 }
 0x29e   : > { %v514_v13 = vperm.slane %v506_v25, %v1982_v41 }
 0x29f   : > { %v491_v29 = vrot.slane %v486_v21, 4  ;;  %v494_v30 = vsel %vm275_vm1, %v486_v21, %v493_v27  ;;  %v504_v31 = vsel %vm275_vm1, %v503_v24, %v478_v17 }
 0x2a0   : > { %v502_v32 = vperm.slane %v494_v30, %v1982_v41  ;;  %v510_v34 = vperm.slane %v504_v31, %v1982_v41  ;;  %v521_v35 = vrot.slane %v514_v13, 4  ;;  %v529_v47 = vpack.c.bf16 %v514_v13, %v514_v13 }
 0x2a1   : > { %v492_v33 = vsel %vm275_vm1, %v491_v29, %v474_v19 }
 0x2a2   : > { %v498_v37 = vperm.slane %v492_v33, %v1982_v41  ;;  %v517_v38 = vrot.slane %v502_v32, 4  ;;  %v519_v39 = vrot.slane %v510_v34, 4  ;;  %v522_v40 = vsel %vm275_vm1, 0.0, %v521_v35 }
 0x2a3   : > { %v530_v44 = vpack.c.bf16 %v522_v40, %v522_v40  ;;  %v525_v54 = vpack.c.bf16 %v502_v32, %v502_v32  ;;  %v527_v55 = vpack.c.bf16 %v510_v34, %v510_v34  ;;  %v538_v56 = vrot.slane %v529_v47, 4 }
 0x2a4   : > { %v515_v42 = vrot.slane %v498_v37, 4  ;;  %v518_v43 = vsel %vm275_vm1, 0.0, %v517_v38  ;;  %v520_v46 = vsel %vm275_vm1, 0.0, %v519_v39  ;;  %v523_v63 = vpack.c.bf16 %v498_v37, %v498_v37 }
 0x2a5   : > { %v526_v49 = vpack.c.bf16 %v518_v43, %v518_v43  ;;  %v528_v51 = vpack.c.bf16 %v520_v46, %v520_v46  ;;  %v558_v52 = vrot.slane %v530_v44, 4  ;;  %v531_v0 = vrot.slane %v527_v55, 4 }
 0x2a6   : > { %v516_v50 = vsel %vm275_vm1, 0.0, %v515_v42 }
 0x2a7   : > { %v524_v57 = vpack.c.bf16 %v516_v50, %v516_v50  ;;  %v552_v59 = vrot.slane %v528_v51, 4  ;;  %v559_v62 = vsel %vm275_vm1, %v558_v52, %v526_v49  ;;  %v533_v12 = vsel %vm275_vm1, %v531_v0, %v523_v63  ;;  %v1636_v51 = vpop.permute.xlu2 %1635 }
 0x2a8   : > { %1626 = vxpose.binary.xlu1.c.b16.start.end [1/2] (short) (narrow) %v774_v2, %v770_v1, 16  ;;  %v539_v1 = vsel %vm275_vm1, %v538_v56, %v525_v54  ;;  %v563_v8 = vperm.slane %v559_v62, %v1964_v23  ;;  %v537_v18 = vperm.slane %v533_v12, %v1964_v23  ;;  %v1638_v54 = vunpack.i.h.bf16 %v1636_v51 }
 0x2a9   : > { %v543_v10 = vperm.slane %v539_v1, %v1964_v23  ;;  %v1637_v55 = vunpack.i.l.bf16 %v1636_v51 }
 0x2aa   : > { %v564_v15 = vrot.slane %v563_v8, 4 }
 0x2ab   : > { %v544_v26 = vrot.slane %v543_v10, 4 }
 0x2ad   : > { %v545_v25 = vsel %vm275_vm1, %v544_v26, %v537_v18 }
 0x2ae   : > { %v549_v31 = vperm.slane %v545_v25, %v1982_v41 }
 0x2b0   : > { %v575_v46 = vshrl.u32 %v549_v31, 16 }
 0x302   : > { %1630 = vrot.lane.b32.xlu1 %v1629_v3, %s1808_s23  ;;  %s218_s23 = scalar_lea.vmem [#allocation7], %s1480_s26 }
 0x303   : > { %s1376_s4 = sshll.u32 %s218_s23, 4  ;;  %s1377_s4 = int_to_ptr.vmem [resolvable:$true] %s1376_s4 }
 0x324   : > { %v2024_v4 = vpop.trf.xlu1 }
 0x325   : > { %v928_v60 = vrot.slane %v2024_v4, 4  ;;  %v553_v4 = vsel %vm275_vm1, %v552_v59, %v524_v57 }
 0x326   : > { %v557_v16 = vperm.slane %v553_v4, %v1964_v23 }
 0x328   : > { %v565_v24 = vsel %vm275_vm1, %v564_v15, %v557_v16 }
 0x329   : > { %v569_v30 = vperm.slane %v565_v24, %v1982_v41 }
 0x32b   : > { %v576_v39 = vshrl.u32 %v569_v30, 16  ;;  %v570_v52 = vrot.slane %v569_v30, 4 }
 0x32c   : > { %v2026_v5 = vpop.trf.xlu1 }
 0x32d   : > { %v948_v28 = vrot.slane %v2026_v5, 4  ;;  %v577_v49 = vpack.i.b16 %v576_v39, %v575_v46  ;;  %v571_v56 = vsel %vm275_vm1, 0, %v570_v52 }
 0x32e   : > { %v582_v63 = vshrl.u32 %v571_v56, 16 }
 0x334   : > { %v1621_v14 = vpop.trf.xlu1 }
 0x33c   : > { %v1622_v22 = vpop.trf.xlu1 }
 0x344   : > { %v1624_v36 = vpop.trf.xlu1 }
 0x345   : > { %v934_v45 = vrot.slane %v1624_v36, 4 }
 0x347   : > { %v935_v53 = vsel %vm275_vm1, %v934_v45, %v1621_v14  ;;  %v574_v45 = vpack.i.b16 %v569_v30, %v549_v31 }
 0x348   : > { %v939_v58 = vperm.slane %v935_v53, %v1964_v23  ;;  %v550_v53 = vrot.slane %v549_v31, 4 }
 0x34a   : > { %v940_v6 = vrot.slane %v939_v58, 4  ;;  %v551_v57 = vsel %vm275_vm1, 0, %v550_v53  ;;  %v363_v58 = vrot.slane %v1638_v54, 4 }
 0x34b   : > { %v580_v0 = vpack.i.b16 %v571_v56, %v551_v57  ;;  %v581_v1 = vshrl.u32 %v551_v57, 16 }
 0x34c   : > { %v1625_v48 = vpop.trf.xlu1 }
 0x34d   : > { %v954_v61 = vrot.slane %v1625_v48, 4 }
 0x34f   : > { %v955_v9 = vsel %vm275_vm1, %v954_v61, %v1622_v22 }
 0x350   : > { %v959_v14 = vperm.slane %v955_v9, %v1964_v23 }
 0x352   : > { %v960_v21 = vrot.slane %v959_v14, 4 }
 0x354   : > { %v1627_v2 = vpop.trf.xlu1 }
 0x355   : > { %v929_v3 = vsel %vm275_vm1, %v928_v60, %v1627_v2  ;;  %v351_v60 = vrot.slane %v1637_v55, 4 }
 0x356   : > { %v933_v7 = vperm.slane %v929_v3, %v1964_v23 }
 0x358   : > { %v941_v11 = vsel %vm275_vm1, %v940_v6, %v933_v7 }
 0x359   : > { %v945_v17 = vperm.slane %v941_v11, %v1982_v41  ;;  %v583_v11 = vpack.i.b16 %v582_v63, %v581_v1 }
 0x35b   : > { %v946_v27 = vrot.slane %v945_v17, 4  ;;  %v971_v13 = vshrl.u32 %v945_v17, 16 }
 0x35c   : > { %v1628_v19 = vpop.trf.xlu1 }
 0x35d   : > { %v949_v20 = vsel %vm275_vm1, %v948_v28, %v1628_v19  ;;  %v947_v34 = vsel %vm275_vm1, 0, %v946_v27 }
 0x35e   : > { %v953_v22 = vperm.slane %v949_v20, %v1964_v23  ;;  %v977_v42 = vshrl.u32 %v947_v34, 16 }
 0x360   : > { %v961_v29 = vsel %vm275_vm1, %v960_v21, %v953_v22 }
 0x361   : > { %v965_v5 = vperm.slane %v961_v29, %v1982_v41 }
 0x363   : > { %v970_v32 = vpack.i.b16 %v965_v5, %v945_v17  ;;  %v972_v33 = vshrl.u32 %v965_v5, 16  ;;  %v966_v35 = vrot.slane %v965_v5, 4 }
 0x365   : > { %v986_v36 = vsel %vm984_vm2, %v970_v32, 0  ;;  %v973_v37 = vpack.i.b16 %v972_v33, %v971_v13  ;;  %v967_v38 = vsel %vm275_vm1, 0, %v966_v35 }
 0x366   : > { %995 = vmatpush.bf16.msra.mxu2 %v986_v36  ;;  %v976_v40 = vpack.i.b16 %v967_v38, %v947_v34  ;;  %v978_v43 = vshrl.u32 %v967_v38, 16 }
 0x367   : > { %v1005_v44 = vsel %vm984_vm2, %v973_v37, 0 }
 0x368   : > { %1014 = vmatpush.bf16.msra.mxu3 %v1005_v44  ;;  %v1024_v47 = vsel %vm984_vm2, %v976_v40, 0  ;;  %v979_v48 = vpack.i.b16 %v978_v43, %v977_v42 }
 0x369   : > { %1499 = vmatmul.msk.bf16.vlgmr.msra.gmra.mxu2 %vm980_vm3, %v574_v45 }
 0x36a   : > { %1033 = vmatpush.bf16.msrb.mxu2 %v1024_v47  ;;  %v1043_v50 = vsel %vm984_vm2, %v979_v48, 0 }
 0x36b   : > { %1500 = vmatmul.msk.bf16.vlgmr.msra.gmra.mxu3 %vm980_vm3, %v577_v49 }
 0x36c   : > { %1052 = vmatpush.bf16.msrb.mxu3 %v1043_v50 }
 0x374   : > { %v1631_v59 = vpop.permute.xlu1 %1630 }
 0x375   : > { %v1633_v61 = vunpack.i.h.bf16 %v1631_v59  ;;  %v1632_v62 = vunpack.i.l.bf16 %v1631_v59 }
 0x377   : > { %v364_v2 = vsel %vm275_vm1, %v363_v58, %v1633_v61  ;;  %v365_v3 = vrot.slane %v1633_v61, 4  ;;  %v352_v6 = vsel %vm275_vm1, %v351_v60, %v1632_v62  ;;  %v353_v7 = vrot.slane %v1632_v62, 4 }
 0x378   : > { %v370_v8 = vperm.slane %v364_v2, %v1964_v23  ;;  %v358_v9 = vperm.slane %v352_v6, %v1964_v23 }
 0x379   : > { %v366_v10 = vsel %vm275_vm1, %v1638_v54, %v365_v3  ;;  %v354_v4 = vsel %vm275_vm1, %v1637_v55, %v353_v7  ;;  %1501 = vmatmul.msk.bf16.vlgmr.msrb.gmra.mxu2 %vm980_vm3, %v580_v0 }
 0x37a   : > { %v374_v12 = vperm.slane %v366_v10, %v1964_v23  ;;  %v375_v14 = vrot.slane %v370_v8, 4  ;;  %v362_v16 = vperm.slane %v354_v4, %v1964_v23  ;;  %v377_v15 = vrot.slane %v358_v9, 4 }
 0x37b   : > { %1502 = vmatmul.msk.bf16.vlgmr.msrb.gmra.mxu3 %vm980_vm3, %v583_v11 }
 0x37c   : > { %v387_v28 = vrot.slane %v374_v12, 4  ;;  %v376_v17 = vsel %vm275_vm1, %v375_v14, %v358_v9  ;;  %v378_v18 = vsel %vm275_vm1, %v370_v8, %v377_v15  ;;  %v389_v26 = vrot.slane %v362_v16, 4 }
 0x37d   : > { %v382_v19 = vperm.slane %v376_v17, %v1982_v41  ;;  %v386_v20 = vperm.slane %v378_v18, %v1982_v41 }
 0x37e   : > { %v388_v21 = vsel %vm275_vm1, %v387_v28, %v362_v16  ;;  %v390_v22 = vsel %vm275_vm1, %v374_v12, %v389_v26 }
 0x37f   : > { %v394_v24 = vperm.slane %v388_v21, %v1982_v41  ;;  %v398_v25 = vperm.slane %v390_v22, %v1982_v41  ;;  %v399_v27 = vrot.slane %v382_v19, 4  ;;  %v401_v29 = vrot.slane %v386_v20, 4 }
 0x380   : > { %v407_v35 = vpack.c.bf16 %v382_v19, %v382_v19  ;;  %v409_v36 = vpack.c.bf16 %v386_v20, %v386_v20 }
 0x381   : > { %v403_v5 = vrot.slane %v394_v24, 4  ;;  %v405_v30 = vrot.slane %v398_v25, 4  ;;  %v400_v13 = vsel %vm275_vm1, 0.0, %v399_v27  ;;  %v402_v31 = vsel %vm275_vm1, 0.0, %v401_v29 }
 0x382   : > { %v411_v32 = vpack.c.bf16 %v394_v24, %v394_v24  ;;  %v413_v33 = vpack.c.bf16 %v398_v25, %v398_v25  ;;  %v408_v43 = vpack.c.bf16 %v400_v13, %v400_v13  ;;  %v410_v44 = vpack.c.bf16 %v402_v31, %v402_v31 }
 0x383   : > { %v406_v34 = vsel %vm275_vm1, 0.0, %v405_v30  ;;  %v404_v37 = vsel %vm275_vm1, 0.0, %v403_v5 }
 0x384   : > { %v1098_v38 = vrot.slane %v411_v32, 4  ;;  %v1104_v39 = vrot.slane %v413_v33, 4  ;;  %v412_v40 = vpack.c.bf16 %v404_v37, %v404_v37  ;;  %v414_v42 = vpack.c.bf16 %v406_v34, %v406_v34 }
 0x386   : > { %v1099_v45 = vsel %vm275_vm1, %v1098_v38, %v407_v35  ;;  %v1105_v46 = vsel %vm275_vm1, %v1104_v39, %v409_v36  ;;  %v1118_v47 = vrot.slane %v412_v40, 4  ;;  %v1124_v48 = vrot.slane %v414_v42, 4 }
 0x387   : > { %v1109_v49 = vperm.slane %v1105_v46, %v1964_v23  ;;  %v1103_v52 = vperm.slane %v1099_v45, %v1964_v23 }
 0x388   : > { %v1119_v50 = vsel %vm275_vm1, %v1118_v47, %v408_v43  ;;  %v1125_v51 = vsel %vm275_vm1, %v1124_v48, %v410_v44 }
 0x389   : > { %v1110_v53 = vrot.slane %v1109_v49, 4  ;;  %v1129_v54 = vperm.slane %v1125_v51, %v1964_v23  ;;  %v1123_v56 = vperm.slane %v1119_v50, %v1964_v23 }
 0x38b   : > { %v1111_v55 = vsel %vm275_vm1, %v1110_v53, %v1103_v52  ;;  %v1130_v57 = vrot.slane %v1129_v54, 4 }
 0x38c   : > { %v1115_v58 = vperm.slane %v1111_v55, %v1982_v41 }
 0x38d   : > { %v1131_v59 = vsel %vm275_vm1, %v1130_v57, %v1123_v56 }
 0x38e   : > { %v1135_v60 = vperm.slane %v1131_v59, %v1982_v41  ;;  %v1116_v61 = vrot.slane %v1115_v58, 4  ;;  %v1141_v62 = vshrl.u32 %v1115_v58, 16 }
 0x390   : > { %v1140_v63 = vpack.i.b16 %v1135_v60, %v1115_v58  ;;  %v1142_v0 = vshrl.u32 %v1135_v60, 16  ;;  %v1117_v1 = vsel %vm275_vm1, 0, %v1116_v61  ;;  %v1136_v2 = vrot.slane %v1135_v60, 4 }
 0x391   : > { %v1147_v9 = vshrl.u32 %v1117_v1, 16 }
 0x392   : > { %v1154_v3 = vsel %vm984_vm2, %v1140_v63, 0  ;;  %v1143_v6 = vpack.i.b16 %v1142_v0, %v1141_v62  ;;  %v1137_v7 = vsel %vm275_vm1, 0, %v1136_v2 }
 0x393   : > { %1163 = vmatpush.bf16.msrb.mxu0 %v1154_v3  ;;  %v1146_v8 = vpack.i.b16 %v1137_v7, %v1117_v1  ;;  %v1148_v10 = vshrl.u32 %v1137_v7, 16 }
 0x394   : > { %v1173_v4 = vsel %vm984_vm2, %v1143_v6, 0 }
 0x395   : > { %1182 = vmatpush.bf16.msrb.mxu1 %v1173_v4  ;;  %v1192_v11 = vsel %vm984_vm2, %v1146_v8, 0  ;;  %v1149_v12 = vpack.i.b16 %v1148_v10, %v1147_v9 }
 0x396   : > { %1201 = vmatpush.bf16.msra.mxu2 %v1192_v11 }
 0x397   : > { %v1211_v14 = vsel %vm984_vm2, %v1149_v12, 0 }
 0x398   : > { %1220 = vmatpush.bf16.msra.mxu3 %v1211_v14 }
 0x3ec   : > { %v997_v16 = vpop.f32.mrf.mxu2 }
 0x3ed   : > { %v1058_v22 = vsel %vm980_vm3, %v997_v16, -inf }
 0x3ee   : > { %v1016_v15 = vpop.f32.mrf.mxu3 }
 0x3ef   : > { %v1061_v25 = vsel %vm980_vm3, %v1016_v15, -inf }
 0x3f4   : > { %v999_v28 = vpop.f32.mrf.mxu2 }
 0x3f6   : > { %v1018_v17 = vpop.f32.mrf.mxu3 }
 0x3fc   : > { %v1035_v18 = vpop.f32.mrf.mxu2 }
 0x3fd   : > { %v1064_v26 = vsel %vm980_vm3, %v1035_v18, -inf }
 0x3fe   : > { %v1054_v19 = vpop.f32.mrf.mxu3  ;;  %1065 = vmax.xlane.f32.xlu2 %v1064_v26 }
 0x3ff   : > { %v1067_v20 = vsel %vm980_vm3, %v1054_v19, -inf }
 0x400   : > { %1068 = vmax.xlane.f32.xlu0 %v1067_v20 }
 0x404   : > { %v1037_v21 = vpop.f32.mrf.mxu2 }
 0x406   : > { %v1056_v24 = vpop.f32.mrf.mxu3  ;;  %1059 = vmax.xlane.f32.xlu2 %v1058_v22 }
 0x40e   : > { %1062 = vmax.xlane.f32.xlu2 %v1061_v25 }
 0x471   : > { %v1066_v27 = vpop.xlane.xlu2 %1065 }
 0x472   : > { %v1072_v29 = vsub.f32 %v1035_v18, %v1066_v27 }
 0x473   : > { %v1069_v5 = vpop.xlane.xlu0 %1068 }
 0x474   : > { %v1078_v30 = vmul.f32 1.442695, %v1072_v29  ;;  %v1073_v13 = vsub.f32 %v1054_v19, %v1069_v5 }
 0x476   : > { %1641 = vpow2.f32 %v1078_v30  ;;  %v1080_v31 = vmul.f32 1.442695, %v1073_v13 }
 0x478   : > { %1643 = vpow2.f32 %v1080_v31 }
 0x479   : > { %v1060_v32 = vpop.xlane.xlu2 %1059 }
 0x47a   : > { %v1070_v33 = vsub.f32 %v997_v16, %v1060_v32 }
 0x47c   : > { %v1642_v34 = vpop.eup %1641  ;;  %v1074_v35 = vmul.f32 1.442695, %v1070_v33 }
 0x47d   : > { %v1096_v36 = vpack.c.bf16 %v1642_v34, %v1642_v34  ;;  %v1088_v37 = vsel %vm980_vm3, %v1642_v34, 0.0 }
 0x47e   : > { %v1644_v38 = vpop.eup %1643  ;;  %1645 = vpow2.f32 %v1074_v35  ;;  %1089 = vadd.xlane.f32.xlu0 %v1088_v37 }
 0x47f   : > { %v1097_v39 = vpack.c.bf16 %v1644_v38, %v1644_v38  ;;  %1505 = vmatmul.msk.bf16.vlgmr.msra.gmra.mxu2 %vm980_vm3, %v1096_v36  ;;  %v1091_v40 = vsel %vm980_vm3, %v1644_v38, 0.0 }
 0x480   : > { %1092 = vadd.xlane.f32.xlu2 %v1091_v40 }
 0x481   : > { %1506 = vmatmul.msk.bf16.vlgmr.msra.gmra.mxu3 %vm980_vm3, %v1097_v39  ;;  %v1063_v42 = vpop.xlane.xlu2 %1062 }
 0x482   : > { %v1071_v43 = vsub.f32 %v1016_v15, %v1063_v42 }
 0x484   : > { %v1646_v44 = vpop.eup %1645  ;;  %v1076_v45 = vmul.f32 1.442695, %v1071_v43 }
 0x485   : > { %v1082_v46 = vsel %vm980_vm3, %v1646_v44, 0.0  ;;  %v1094_v47 = vpack.c.bf16 %v1646_v44, %v1646_v44 }
 0x486   : > { %1647 = vpow2.f32 %v1076_v45  ;;  %1083 = vadd.xlane.f32.xlu1 %v1082_v46 }
 0x487   : > { %1503 = vmatmul.msk.bf16.vlgmr.msrb.gmra.mxu0 %vm980_vm3, %v1094_v47 }
 0x48c   : > { %v1648_v48 = vpop.eup %1647 }
 0x48d   : > { %v1085_v49 = vsel %vm980_vm3, %v1648_v48, 0.0  ;;  %v1095_v50 = vpack.c.bf16 %v1648_v48, %v1648_v48 }
 0x48e   : > { %1086 = vadd.xlane.f32.xlu0 %v1085_v49 }
 0x48f   : > { %1504 = vmatmul.msk.bf16.vlgmr.msrb.gmra.mxu1 %vm980_vm3, %v1095_v50 }
 0x4f1   : > { %v1090_v51 = vpop.xlane.xlu0 %1089 }
 0x4f2   : > { %1649 = vrcp.f32 %v1090_v51 }
 0x4f3   : > { %v1093_v53 = vpop.xlane.xlu2 %1092 }
 0x4f8   : > { %v1650_v54 = vpop.eup %1649 }
 0x4f9   : > { %v1084_v52 = vpop.xlane.xlu1 %1083 }
 0x4fa   : > { %1651 = vrcp.f32 %v1084_v52 }
 0x4fb   : > { %1653 = vrcp.f32 %v1093_v53 }
 0x500   : > { %v1652_v58 = vpop.eup %1651 }
 0x501   : > { %v1087_v56 = vpop.xlane.xlu0 %1086  ;;  %v1654_v0 = vpop.eup %1653 }
 0x502   : > { %v1203_v55 = vpop.f32.mrf.mxu2  ;;  %1655 = vrcp.f32 %v1087_v56 }
 0x503   : > { %v1232_v57 = vmul.f32 %v1650_v54, %v1203_v55 }
 0x504   : > { %v1165_v59 = vpop.f32.mrf.mxu0  ;;  %v1222_v60 = vpop.f32.mrf.mxu3 }
 0x505   : > { %v1234_v61 = vrot.slane %v1232_v57, 4  ;;  %v1230_v62 = vmul.f32 %v1652_v58, %v1165_v59  ;;  %v1233_v2 = vmul.f32 %v1654_v0, %v1222_v60 }
 0x507   : > { %v1236_v63 = vrot.slane %v1230_v62, 4  ;;  %v1235_v1 = vsel %vm275_vm1, %v1234_v61, %v1230_v62  ;;  %v1246_v4 = vrot.slane %v1233_v2, 4 }
 0x508   : > { %v1656_v7 = vpop.eup %1655  ;;  %v1241_v8 = vperm.slane %v1235_v1, %v1964_v23 }
 0x509   : > { %v1237_v6 = vsel %vm275_vm1, %v1232_v57, %v1236_v63 }
 0x50a   : > { %v1205_v3 = vpop.f32.mrf.mxu2  ;;  %v1245_v14 = vperm.slane %v1237_v6, %v1964_v23  ;;  %v1260_v28 = vrot.slane %v1241_v8, 4 }
 0x50c   : > { %v1167_v9 = vpop.f32.mrf.mxu0  ;;  %v1184_v10 = vpop.f32.mrf.mxu1  ;;  %v1272_v26 = vrot.slane %v1245_v14, 4 }
 0x50d   : > { %v1231_v11 = vmul.f32 %v1656_v7, %v1184_v10  ;;  %v1224_v12 = vpop.f32.mrf.mxu3 }
 0x50f   : > { %v1247_v16 = vsel %vm275_vm1, %v1246_v4, %v1231_v11  ;;  %v1248_v15 = vrot.slane %v1231_v11, 4 }
 0x510   : > { %v1253_v17 = vperm.slane %v1247_v16, %v1964_v23 }
 0x511   : > { %v1249_v18 = vsel %vm275_vm1, %v1233_v2, %v1248_v15 }
 0x512   : > { %v1257_v19 = vperm.slane %v1249_v18, %v1964_v23  ;;  %v1258_v20 = vrot.slane %v1253_v17, 4  ;;  %v1261_v21 = vsel %vm275_vm1, %v1253_v17, %v1260_v28 }
 0x513   : > { %v1269_v22 = vperm.slane %v1261_v21, %v1982_v41 }
 0x514   : > { %v1259_v24 = vsel %vm275_vm1, %v1258_v20, %v1241_v8  ;;  %v1270_v25 = vrot.slane %v1257_v19, 4  ;;  %v1273_v27 = vsel %vm275_vm1, %v1257_v19, %v1272_v26  ;;  %v1186_v29 = vpop.f32.mrf.mxu1 }
 0x515   : > { %v1265_v5 = vperm.slane %v1259_v24, %v1982_v41  ;;  %v1281_v30 = vperm.slane %v1273_v27, %v1982_v41  ;;  %v1284_v13 = vrot.slane %v1269_v22, 4 }
 0x516   : > { %v1271_v31 = vsel %vm275_vm1, %v1270_v25, %v1245_v14 }
 0x517   : > { %v1277_v32 = vperm.slane %v1271_v31, %v1982_v41  ;;  %v1282_v33 = vrot.slane %v1265_v5, 4  ;;  %v1285_v34 = vsel %vm275_vm1, 0.0, %v1284_v13  ;;  %v1288_v35 = vrot.slane %v1281_v30, 4 }
 0x518   : > { %v1295_v36 = vrot.slane %v1285_v34, 4  ;;  %v1290_v37 = vsel %vm275_vm1, %v1284_v13, %v1265_v5 }
 0x519   : > { %v1286_v38 = vrot.slane %v1277_v32, 4  ;;  %v1289_v39 = vsel %vm275_vm1, 0.0, %v1288_v35  ;;  %v1283_v40 = vsel %vm275_vm1, 0.0, %v1282_v33  ;;  %v1294_v42 = vperm.slane %v1290_v37, %v1964_v23 }
 0x51a   : > { %v1306_v43 = vrot.slane %v1289_v39, 4  ;;  %v1296_v44 = vsel %vm275_vm1, %v1295_v36, %v1283_v40  ;;  %v1301_v45 = vsel %vm275_vm1, %v1288_v35, %v1277_v32 }
 0x51b   : > { %v1287_v46 = vsel %vm275_vm1, 0.0, %v1286_v38  ;;  %v1300_v47 = vperm.slane %v1296_v44, %v1964_v23  ;;  %v1305_v48 = vperm.slane %v1301_v45, %v1964_v23  ;;  %v1314_v49 = vrot.slane %v1294_v42, 4 }
 0x51c   : > { %v1307_v50 = vsel %vm275_vm1, %v1306_v43, %v1287_v46 }
 0x51d   : > { %v1311_v51 = vperm.slane %v1307_v50, %v1964_v23  ;;  %v1326_v52 = vrot.slane %v1305_v48, 4  ;;  %v1312_v53 = vrot.slane %v1300_v47, 4  ;;  %v1315_v54 = vsel %vm275_vm1, %v1300_v47, %v1314_v49 }
 0x51e   : > { %v1323_v61 = vperm.slane %v1315_v54, %v1982_v41 }
 0x51f   : > { %v1327_v55 = vsel %vm275_vm1, %v1311_v51, %v1326_v52  ;;  %v1313_v56 = vsel %vm275_vm1, %v1312_v53, %v1294_v42  ;;  %v1324_v57 = vrot.slane %v1311_v51, 4 }
 0x520   : > { %v1335_v58 = vperm.slane %v1327_v55, %v1982_v41  ;;  %v1319_v59 = vperm.slane %v1313_v56, %v1982_v41  ;;  %v1342_v6 = vrot.slane %v1323_v61, 4 }
 0x521   : > { %v1325_v60 = vsel %vm275_vm1, %v1324_v57, %v1305_v48 }
 0x522   : > { %v1340_v62 = vrot.slane %v1335_v58, 4  ;;  %v1331_v23 = vperm.slane %v1325_v60, %v1982_v41  ;;  %v1338_v63 = vrot.slane %v1319_v59, 4  ;;  %v1343_v7 = vsel %vm275_vm1, %v1335_v58, %v1342_v6 }
 0x524   : > { %v1341_v0 = vsel %vm275_vm1, %v1340_v62, %v1323_v61  ;;  %v1336_v1 = vrot.slane %v1331_v23, 4  ;;  %v1339_v2 = vsel %vm275_vm1, %v1331_v23, %v1338_v63 }
 0x525   : > { %1349 = vrot.lane.b32.xlu0 %v1341_v0, %s1814_s18  ;;  %1345 = vrot.lane.b32.xlu2 %v1339_v2, %s1815_s24 }
 0x526   : > { %v1337_v3 = vsel %vm275_vm1, %v1336_v1, %v1319_v59 }
 0x52d   : > { %1353 = vrot.lane.b32.xlu0 %v1343_v7, %s1816_s25 }
 0x57f   : > { %v1346_v8 = vpop.permute.xlu2 %1345 }
 0x580   : > { %v1356_v9 = vsel %vm980_vm3, %v1337_v3, %v1346_v8 }
 0x597   : > { %v1350_v41 = vpop.permute.xlu0 %1349 }
 0x598   : > { %v1358_v10 = vsel %vm1357_vm4, %v1356_v9, %v1350_v41 }
 0x59f   : > { %v1354_v4 = vpop.permute.xlu0 %1353 }
 0x5a0   : > { %v1360_v11 = vsel %vm1359_vm5, %v1358_v10, %v1354_v4 }
 0x5a1   : > { %1361 = vst.msk [vmem:[%s218_s23] sm:$0xff] %vm247_vm0, %v1360_v11 }
 0x5a2   : > { %1744 = shalt.err (!%p1741_p13)
}
 0x5a3   : > { %1521 = dma.vmem_to_hbm [thread:$0]  (%p1908_p4), %s1377_s4, 128, %s1379_s5, %s1363_s15  }
 0x5a4 PF: > { %s1390_s28 = sand.u32 1, %s1783_s12   ;;  %p1532_p0 = pnand %p1474_p6, %p1916_p7 }
 0x5a5   : > { %s1391_s25 = scalar_lea.sflag [#allocation4], %s1390_s28 }
 0x5a6   : > { %p1533_p2 = pneg %p1532_p0 }
 0x5a8   : > { %1778 = dma.done.wait (%p1533_p2), %s1391_s25, 128  }
 0x5a9   : > { %1780 = vsyncadd (%p1533_p2), %s1391_s25, 4294967168  ;;  %s20_s17 = sadd.s32 1, %s1803_s17   ;;  %s2230_s12 = smov %s1787_s13 }
 0x5aa   : > { %p17_p5 = scmp.ge.s32.totalorder %s20_s17, 4   ;;  %s2231_s13 = smov %s1791_s14 }
 0x5ab   : > { %s2232_s14 = smov %s1914_s8  ;;  %s2233_s15 = smov %s1799_s16 }
 0x5ac   : > { %s2234_s16 = smov %s2236_s29  ;;  %19 = sbr.rel (!%p17_p5) target bundleno = 7 (0x7), region = 82 }
 0x5b1   :  { %1397 = vsyncpa [#allocation3], 1 }
 0x5b2   :  { %1399 = vsyncpa [#allocation3 + $0x1], 1 }
 0x5b3   :  { %1400 = vsyncpa [#allocation6], 1 }
 0x5b4   :  { %1401 = vsyncpa [#allocation4], 1 }
 0x5b5   :  { %1403 = vsyncpa [#allocation4 + $0x1], 1 }

</bundles_post_ra>
